<compile_context>
chip_gen: v6e
topology: v6e:2x2x1
jax: 0.10.0
libtpu: 0.0.40
codegen_flags: <defaults>
</compile_context>

<pallas_src>
import jax
import jax.numpy as jnp
from jax.experimental import pallas as pl
from jax.experimental.pallas import tpu as pltpu

EPS = 1e-5


def _bn_fold(h, gamma, beta, inv_m):
    """Training-mode BatchNorm folded to one per-channel FMA.

    One-pass stats (sum / sum-of-squares), biased variance:
        scale = gamma * rsqrt(var + eps),  shift = beta - mean * scale
    h: (M, C) f32; gamma/beta: (1, C) f32.  Returns (scale, shift), each (1, C).
    """
    s = jnp.sum(h, axis=0, keepdims=True)
    ss = jnp.sum(h * h, axis=0, keepdims=True)
    mean = s * inv_m
    var = ss * inv_m - mean * mean
    scale = gamma * jax.lax.rsqrt(var + EPS)
    shift = beta - mean * scale
    return scale, shift


def bottleneck_kernel(x_ref, w1_ref, w2_ref, w3_ref, sm_ref,
                      g1_ref, b1_ref, g2_ref, b2_ref, g3_ref, b3_ref, o_ref):
    M = x_ref.shape[0]
    inv_m = 1.0 / M

    x = x_ref[...]                                  # (M, Cin) f32, also residual
    xb = x.astype(jnp.bfloat16)

    # ---- conv1 (1x1) -> bn1 -> relu ------------------------------------------
    h1 = jnp.dot(xb, w1_ref[...], preferred_element_type=jnp.float32)
    s1, t1 = _bn_fold(h1, g1_ref[...], b1_ref[...], inv_m)
    h1n = jnp.maximum(h1 * s1 + t1, 0.0).astype(jnp.bfloat16)      # (M, C1) bf16

    # ---- conv2 (3x3, stride=1, pad=1) -> bn2 -> relu -------------------------
    # sm_ref[k] is the host-built 0/1 operator that gathers, for every output
    # pixel, its (kh-1, kw-1) neighbour within the same image (rows of zeros
    # realize the conv's zero padding / image borders).  The gather runs on the
    # MXU (K = M contraction) so the im2col never exists outside VMEM/vregs.
    C2 = w2_ref.shape[2]
    acc = jnp.zeros((M, C2), jnp.float32)
    for k in range(9):
        tap = jnp.dot(sm_ref[k], h1n, preferred_element_type=jnp.float32)
        # tap values are exactly (shifted) bf16 values -> the cast is exact.
        acc = acc + jnp.dot(tap.astype(jnp.bfloat16), w2_ref[k],
                            preferred_element_type=jnp.float32)
    s2, t2 = _bn_fold(acc, g2_ref[...], b2_ref[...], inv_m)
    h2n = jnp.maximum(acc * s2 + t2, 0.0).astype(jnp.bfloat16)     # (M, C2) bf16

    # ---- conv3 (1x1) -> bn3 -> +residual -> relu ------------------------------
    h3 = jnp.dot(h2n, w3_ref[...], preferred_element_type=jnp.float32)
    s3, t3 = _bn_fold(h3, g3_ref[...], b3_ref[...], inv_m)
    o_ref[...] = jnp.maximum(h3 * s3 + t3 + x, 0.0)


def _shift_mask_operators(N, H, W):
    """(9, M, M) 0/1 gather operators for the 3x3 conv (tap k = kh*3 + kw).

    SM[k] @ h picks, for each output pixel (n, y, x), the activation at
    (n, y+kh-1, x+kw-1); rows whose tap falls outside the image are all-zero,
    which implements the conv's zero padding.  Host-side layout glue only.
    """
    M = N * H * W
    q = jnp.arange(M)
    n = q // (H * W)
    y = (q % (H * W)) // W
    x = q % W
    cols = jnp.arange(M)[None, :]
    mats = []
    for kh in range(3):
        for kw in range(3):
            yy = y + kh - 1
            xx = x + kw - 1
            valid = (yy >= 0) & (yy < H) & (xx >= 0) & (xx < W)
            src = n * (H * W) + yy * W + xx
            mats.append((cols == src[:, None]) & valid[:, None])
    return jnp.stack(mats, axis=0).astype(jnp.float32)


def bottleneck_forward(x_nchw, params):
    (w1, g1, b1, w2, g2, b2, w3, g3, b3) = params
    N, Cin, H, W = x_nchw.shape
    C1, C2, Cout = w1.shape[1], w2.shape[2], w3.shape[1]
    assert Cin == Cout, "identity residual requires inplanes == planes * 4"
    M = N * H * W

    # NCHW -> (M, C) channel-last rows; x is passed once and reused for conv1
    # and the residual inside the kernel.
    x2d = jnp.transpose(x_nchw, (0, 2, 3, 1)).reshape(M, Cin).astype(jnp.float32)
    sm = _shift_mask_operators(N, H, W).astype(jnp.bfloat16)   # 0/1 -> exact
    w1b = w1.astype(jnp.bfloat16)
    w2b = w2.astype(jnp.bfloat16)
    w3b = w3.astype(jnp.bfloat16)

    def full(shape):
        return pl.BlockSpec(shape, lambda i: (0,) * len(shape))

    out2d = pl.pallas_call(
        bottleneck_kernel,
        out_shape=jax.ShapeDtypeStruct((M, Cout), jnp.float32),
        grid=(1,),
        in_specs=[full((M, Cin)),
                  full((Cin, C1)), full((9, C1, C2)), full((C2, Cout)),
                  full((9, M, M)),
                  full((1, C1)), full((1, C1)),
                  full((1, C2)), full((1, C2)),
                  full((1, Cout)), full((1, Cout))],
        out_specs=full((M, Cout)),
        compiler_params=pltpu.CompilerParams(
            dimension_semantics=("arbitrary",),
            vmem_limit_bytes=32 * 1024 * 1024),
    )(x2d, w1b, w2b, w3b, sm, g1, b1, g2, b2, g3, b3)

    return out2d.reshape(N, H, W, Cout).transpose(0, 3, 1, 2)   # back to NCHW


def bottleneck_reference(x_nchw, params):
    # Independent reference path (XLA convs) mirroring the kernel's arithmetic:
    # conv operands in bf16, accumulation / BN / residual in f32.
    (w1, g1, b1, w2, g2, b2, w3, g3, b3) = params
    x = jnp.transpose(x_nchw, (0, 2, 3, 1)).astype(jnp.float32)
    dn = ('NHWC', 'HWIO', 'NHWC')

    def conv(h, w_hwio, padding):
        return jax.lax.conv_general_dilated(
            h.astype(jnp.bfloat16), w_hwio.astype(jnp.bfloat16), (1, 1), padding,
            dimension_numbers=dn, preferred_element_type=jnp.float32)

    def bn(h, gamma, beta):
        mean = jnp.mean(h, axis=(0, 1, 2), keepdims=True)
        var = jnp.mean((h - mean) ** 2, axis=(0, 1, 2), keepdims=True)
        return ((h - mean) * jax.lax.rsqrt(var + EPS)
                * gamma.reshape(1, 1, 1, -1) + beta.reshape(1, 1, 1, -1))

    h1 = jnp.maximum(bn(conv(x, w1[None, None], 'VALID'), g1, b1), 0.0)
    w2_hwio = w2.reshape(3, 3, w2.shape[1], w2.shape[2])
    h2 = jnp.maximum(bn(conv(h1, w2_hwio, ((1, 1), (1, 1))), g2, b2), 0.0)
    h3 = bn(conv(h2, w3[None, None], 'VALID'), g3, b3)
    out = jnp.maximum(h3 + x, 0.0)
    return jnp.transpose(out, (0, 3, 1, 2))


if __name__ == "__main__":
    # Module config: Bottleneck(inplanes=16, planes=4, cfg=[16, 8, 8],
    #                           stride=1, downsample=None)
    N, H, W = 2, 8, 8
    inplanes, planes = 16, 4
    cfg = (inplanes, 8, 8)
    C1, C2, Cout = cfg[1], cfg[2], planes * 4

    key = jax.random.PRNGKey(0)
    ks = jax.random.split(key, 10)
    x = jax.random.normal(ks[0], (N, inplanes, H, W), jnp.float32)  # NCHW

    # conv weights stored as matmul matrices: w1 (Cin, C1); w2 (9, C1, C2) with
    # tap index k = kh*3 + kw (== torch conv2.weight[co, ci, kh, kw] transposed);
    # w3 (C2, Cout).  BN gammas/betas deterministic but non-trivial.
    w1 = 0.2 * jax.random.normal(ks[1], (cfg[0], C1), jnp.float32)
    w2 = 0.1 * jax.random.normal(ks[2], (9, C1, C2), jnp.float32)
    w3 = 0.2 * jax.random.normal(ks[3], (C2, Cout), jnp.float32)
    g1 = 1.0 + 0.1 * jax.random.normal(ks[4], (1, C1), jnp.float32)
    b1 = 0.1 * jax.random.normal(ks[5], (1, C1), jnp.float32)
    g2 = 1.0 + 0.1 * jax.random.normal(ks[6], (1, C2), jnp.float32)
    b2 = 0.1 * jax.random.normal(ks[7], (1, C2), jnp.float32)
    g3 = 1.0 + 0.1 * jax.random.normal(ks[8], (1, Cout), jnp.float32)
    b3 = 0.1 * jax.random.normal(ks[9], (1, Cout), jnp.float32)
    params = (w1, g1, b1, w2, g2, b2, w3, g3, b3)

    out = jax.block_until_ready(bottleneck_forward(x, params))
    ref = bottleneck_reference(x, params)
    assert out.shape == (N, Cout, H, W), out.shape
    max_err = float(jnp.max(jnp.abs(out - ref)))
    if not jnp.allclose(out, ref, atol=1e-2, rtol=1e-2):
        raise AssertionError(f"kernel/reference mismatch, max abs err = {max_err}")
    print("KERNEL_OK")
</pallas_src>

<mosaic_0001>
module attributes {stable_mosaic.version = 11 : i64} {
  func.func @bottleneck_kernel(%arg0: i32, %arg1: memref<128x16xf32, #tpu.memory_space<vmem>>, %arg2: memref<16x8xbf16, #tpu.memory_space<vmem>>, %arg3: memref<9x8x8xbf16, #tpu.memory_space<vmem>>, %arg4: memref<8x16xbf16, #tpu.memory_space<vmem>>, %arg5: memref<9x128x128xbf16, #tpu.memory_space<vmem>>, %arg6: memref<1x8xf32, #tpu.memory_space<vmem>>, %arg7: memref<1x8xf32, #tpu.memory_space<vmem>>, %arg8: memref<1x8xf32, #tpu.memory_space<vmem>>, %arg9: memref<1x8xf32, #tpu.memory_space<vmem>>, %arg10: memref<1x16xf32, #tpu.memory_space<vmem>>, %arg11: memref<1x16xf32, #tpu.memory_space<vmem>>, %arg12: memref<128x16xf32, #tpu.memory_space<vmem>>) attributes {dimension_semantics = [#tpu.dimension_semantics<arbitrary>], iteration_bounds = array<i64: 1>, scalar_prefetch = 0 : i64, scratch_operands = 0 : i64, tpu.core_type = #tpu.core_type<tc>, window_params = [{pipeline_mode = #tpu.pipeline_mode<synchronous>, transform_indices = @transform_0, window_bounds = array<i64: 128, 16>}, {pipeline_mode = #tpu.pipeline_mode<synchronous>, transform_indices = @transform_1, window_bounds = array<i64: 16, 8>}, {pipeline_mode = #tpu.pipeline_mode<synchronous>, transform_indices = @transform_2, window_bounds = array<i64: 9, 8, 8>}, {pipeline_mode = #tpu.pipeline_mode<synchronous>, transform_indices = @transform_3, window_bounds = array<i64: 8, 16>}, {pipeline_mode = #tpu.pipeline_mode<synchronous>, transform_indices = @transform_4, window_bounds = array<i64: 9, 128, 128>}, {pipeline_mode = #tpu.pipeline_mode<synchronous>, transform_indices = @transform_5, window_bounds = array<i64: 1, 8>}, {pipeline_mode = #tpu.pipeline_mode<synchronous>, transform_indices = @transform_6, window_bounds = array<i64: 1, 8>}, {pipeline_mode = #tpu.pipeline_mode<synchronous>, transform_indices = @transform_7, window_bounds = array<i64: 1, 8>}, {pipeline_mode = #tpu.pipeline_mode<synchronous>, transform_indices = @transform_8, window_bounds = array<i64: 1, 8>}, {pipeline_mode = #tpu.pipeline_mode<synchronous>, transform_indices = @transform_9, window_bounds = array<i64: 1, 16>}, {pipeline_mode = #tpu.pipeline_mode<synchronous>, transform_indices = @transform_10, window_bounds = array<i64: 1, 16>}, {pipeline_mode = #tpu.pipeline_mode<synchronous>, transform_indices = @transform_11, window_bounds = array<i64: 128, 16>}]} {
    %c0 = arith.constant 0 : index
    %c0_0 = arith.constant 0 : index
    %0 = vector.load %arg1[%c0, %c0_0] : memref<128x16xf32, #tpu.memory_space<vmem>>, vector<128x16xf32>
    %1 = arith.truncf %0 : vector<128x16xf32> to vector<128x16xbf16>
    %c0_1 = arith.constant 0 : index
    %c0_2 = arith.constant 0 : index
    %2 = vector.load %arg2[%c0_1, %c0_2] : memref<16x8xbf16, #tpu.memory_space<vmem>>, vector<16x8xbf16>
    %cst = arith.constant dense<0.000000e+00> : vector<128x8xf32>
    %3 = tpu.matmul %1, %2, %cst {dimension_numbers = #tpu.dot_dimension_numbers<[1], [0], [0], [1], [0, 0, 1, 1], [], []>} : vector<128x16xbf16>, vector<16x8xbf16>, vector<128x8xf32> -> vector<128x8xf32>
    %c0_3 = arith.constant 0 : index
    %c0_4 = arith.constant 0 : index
    %4 = vector.load %arg6[%c0_3, %c0_4] : memref<1x8xf32, #tpu.memory_space<vmem>>, vector<1x8xf32>
    %c0_5 = arith.constant 0 : index
    %c0_6 = arith.constant 0 : index
    %5 = vector.load %arg7[%c0_5, %c0_6] : memref<1x8xf32, #tpu.memory_space<vmem>>, vector<1x8xf32>
    %cst_7 = arith.constant dense<0.000000e+00> : vector<8xf32>
    %6 = vector.multi_reduction <add>, %3, %cst_7 [0] : vector<128x8xf32> to vector<8xf32>
    %7 = vector.shape_cast %6 : vector<8xf32> to vector<1x8xf32>
    %8 = arith.mulf %3, %3 : vector<128x8xf32>
    %cst_8 = arith.constant dense<0.000000e+00> : vector<8xf32>
    %9 = vector.multi_reduction <add>, %8, %cst_8 [0] : vector<128x8xf32> to vector<8xf32>
    %10 = vector.shape_cast %9 : vector<8xf32> to vector<1x8xf32>
    %cst_9 = arith.constant 7.812500e-03 : f32
    %11 = vector.broadcast %cst_9 : f32 to vector<1x8xf32>
    %12 = arith.mulf %7, %11 : vector<1x8xf32>
    %cst_10 = arith.constant 7.812500e-03 : f32
    %13 = vector.broadcast %cst_10 : f32 to vector<1x8xf32>
    %14 = arith.mulf %10, %13 : vector<1x8xf32>
    %15 = arith.mulf %12, %12 : vector<1x8xf32>
    %16 = arith.subf %14, %15 : vector<1x8xf32>
    %cst_11 = arith.constant 9.99999974E-6 : f32
    %17 = vector.broadcast %cst_11 : f32 to vector<1x8xf32>
    %18 = arith.addf %16, %17 : vector<1x8xf32>
    %19 = math.rsqrt %18 : vector<1x8xf32>
    %20 = arith.mulf %4, %19 : vector<1x8xf32>
    %21 = arith.mulf %12, %20 : vector<1x8xf32>
    %22 = arith.subf %5, %21 : vector<1x8xf32>
    %23 = vector.broadcast %20 : vector<1x8xf32> to vector<128x8xf32>
    %24 = arith.mulf %3, %23 : vector<128x8xf32>
    %25 = vector.broadcast %22 : vector<1x8xf32> to vector<128x8xf32>
    %26 = arith.addf %24, %25 : vector<128x8xf32>
    %cst_12 = arith.constant 0.000000e+00 : f32
    %27 = vector.broadcast %cst_12 : f32 to vector<128x8xf32>
    %28 = arith.maximumf %26, %27 : vector<128x8xf32>
    %29 = arith.truncf %28 : vector<128x8xf32> to vector<128x8xbf16>
    %cst_13 = arith.constant 0.000000e+00 : f32
    %30 = vector.broadcast %cst_13 : f32 to vector<128x8xf32>
    %c0_14 = arith.constant 0 : index
    %c0_15 = arith.constant 0 : index
    %c0_16 = arith.constant 0 : index
    %31 = vector.load %arg5[%c0_14, %c0_15, %c0_16] : memref<9x128x128xbf16, #tpu.memory_space<vmem>>, vector<1x128x128xbf16>
    %32 = vector.shape_cast %31 : vector<1x128x128xbf16> to vector<128x128xbf16>
    %cst_17 = arith.constant dense<0.000000e+00> : vector<128x8xf32>
    %33 = tpu.matmul %32, %29, %cst_17 {dimension_numbers = #tpu.dot_dimension_numbers<[1], [0], [0], [1], [0, 0, 1, 1], [], []>} : vector<128x128xbf16>, vector<128x8xbf16>, vector<128x8xf32> -> vector<128x8xf32>
    %34 = arith.truncf %33 : vector<128x8xf32> to vector<128x8xbf16>
    %c0_18 = arith.constant 0 : index
    %c0_19 = arith.constant 0 : index
    %c0_20 = arith.constant 0 : index
    %35 = vector.load %arg3[%c0_18, %c0_19, %c0_20] : memref<9x8x8xbf16, #tpu.memory_space<vmem>>, vector<1x8x8xbf16>
    %36 = vector.shape_cast %35 : vector<1x8x8xbf16> to vector<8x8xbf16>
    %cst_21 = arith.constant dense<0.000000e+00> : vector<128x8xf32>
    %37 = tpu.matmul %34, %36, %cst_21 {dimension_numbers = #tpu.dot_dimension_numbers<[1], [0], [0], [1], [0, 0, 1, 1], [], []>} : vector<128x8xbf16>, vector<8x8xbf16>, vector<128x8xf32> -> vector<128x8xf32>
    %38 = arith.addf %30, %37 : vector<128x8xf32>
    %c1 = arith.constant 1 : index
    %c0_22 = arith.constant 0 : index
    %c0_23 = arith.constant 0 : index
    %39 = vector.load %arg5[%c1, %c0_22, %c0_23] : memref<9x128x128xbf16, #tpu.memory_space<vmem>>, vector<1x128x128xbf16>
    %40 = vector.shape_cast %39 : vector<1x128x128xbf16> to vector<128x128xbf16>
    %cst_24 = arith.constant dense<0.000000e+00> : vector<128x8xf32>
    %41 = tpu.matmul %40, %29, %cst_24 {dimension_numbers = #tpu.dot_dimension_numbers<[1], [0], [0], [1], [0, 0, 1, 1], [], []>} : vector<128x128xbf16>, vector<128x8xbf16>, vector<128x8xf32> -> vector<128x8xf32>
    %42 = arith.truncf %41 : vector<128x8xf32> to vector<128x8xbf16>
    %c1_25 = arith.constant 1 : index
    %c0_26 = arith.constant 0 : index
    %c0_27 = arith.constant 0 : index
    %43 = vector.load %arg3[%c1_25, %c0_26, %c0_27] : memref<9x8x8xbf16, #tpu.memory_space<vmem>>, vector<1x8x8xbf16>
    %44 = vector.shape_cast %43 : vector<1x8x8xbf16> to vector<8x8xbf16>
    %cst_28 = arith.constant dense<0.000000e+00> : vector<128x8xf32>
    %45 = tpu.matmul %42, %44, %cst_28 {dimension_numbers = #tpu.dot_dimension_numbers<[1], [0], [0], [1], [0, 0, 1, 1], [], []>} : vector<128x8xbf16>, vector<8x8xbf16>, vector<128x8xf32> -> vector<128x8xf32>
    %46 = arith.addf %38, %45 : vector<128x8xf32>
    %c2 = arith.constant 2 : index
    %c0_29 = arith.constant 0 : index
    %c0_30 = arith.constant 0 : index
    %47 = vector.load %arg5[%c2, %c0_29, %c0_30] : memref<9x128x128xbf16, #tpu.memory_space<vmem>>, vector<1x128x128xbf16>
    %48 = vector.shape_cast %47 : vector<1x128x128xbf16> to vector<128x128xbf16>
    %cst_31 = arith.constant dense<0.000000e+00> : vector<128x8xf32>
    %49 = tpu.matmul %48, %29, %cst_31 {dimension_numbers = #tpu.dot_dimension_numbers<[1], [0], [0], [1], [0, 0, 1, 1], [], []>} : vector<128x128xbf16>, vector<128x8xbf16>, vector<128x8xf32> -> vector<128x8xf32>
    %50 = arith.truncf %49 : vector<128x8xf32> to vector<128x8xbf16>
    %c2_32 = arith.constant 2 : index
    %c0_33 = arith.constant 0 : index
    %c0_34 = arith.constant 0 : index
    %51 = vector.load %arg3[%c2_32, %c0_33, %c0_34] : memref<9x8x8xbf16, #tpu.memory_space<vmem>>, vector<1x8x8xbf16>
    %52 = vector.shape_cast %51 : vector<1x8x8xbf16> to vector<8x8xbf16>
    %cst_35 = arith.constant dense<0.000000e+00> : vector<128x8xf32>
    %53 = tpu.matmul %50, %52, %cst_35 {dimension_numbers = #tpu.dot_dimension_numbers<[1], [0], [0], [1], [0, 0, 1, 1], [], []>} : vector<128x8xbf16>, vector<8x8xbf16>, vector<128x8xf32> -> vector<128x8xf32>
    %54 = arith.addf %46, %53 : vector<128x8xf32>
    %c3 = arith.constant 3 : index
    %c0_36 = arith.constant 0 : index
    %c0_37 = arith.constant 0 : index
    %55 = vector.load %arg5[%c3, %c0_36, %c0_37] : memref<9x128x128xbf16, #tpu.memory_space<vmem>>, vector<1x128x128xbf16>
    %56 = vector.shape_cast %55 : vector<1x128x128xbf16> to vector<128x128xbf16>
    %cst_38 = arith.constant dense<0.000000e+00> : vector<128x8xf32>
    %57 = tpu.matmul %56, %29, %cst_38 {dimension_numbers = #tpu.dot_dimension_numbers<[1], [0], [0], [1], [0, 0, 1, 1], [], []>} : vector<128x128xbf16>, vector<128x8xbf16>, vector<128x8xf32> -> vector<128x8xf32>
    %58 = arith.truncf %57 : vector<128x8xf32> to vector<128x8xbf16>
    %c3_39 = arith.constant 3 : index
    %c0_40 = arith.constant 0 : index
    %c0_41 = arith.constant 0 : index
    %59 = vector.load %arg3[%c3_39, %c0_40, %c0_41] : memref<9x8x8xbf16, #tpu.memory_space<vmem>>, vector<1x8x8xbf16>
    %60 = vector.shape_cast %59 : vector<1x8x8xbf16> to vector<8x8xbf16>
    %cst_42 = arith.constant dense<0.000000e+00> : vector<128x8xf32>
    %61 = tpu.matmul %58, %60, %cst_42 {dimension_numbers = #tpu.dot_dimension_numbers<[1], [0], [0], [1], [0, 0, 1, 1], [], []>} : vector<128x8xbf16>, vector<8x8xbf16>, vector<128x8xf32> -> vector<128x8xf32>
    %62 = arith.addf %54, %61 : vector<128x8xf32>
    %c4 = arith.constant 4 : index
    %c0_43 = arith.constant 0 : index
    %c0_44 = arith.constant 0 : index
    %63 = vector.load %arg5[%c4, %c0_43, %c0_44] : memref<9x128x128xbf16, #tpu.memory_space<vmem>>, vector<1x128x128xbf16>
    %64 = vector.shape_cast %63 : vector<1x128x128xbf16> to vector<128x128xbf16>
    %cst_45 = arith.constant dense<0.000000e+00> : vector<128x8xf32>
    %65 = tpu.matmul %64, %29, %cst_45 {dimension_numbers = #tpu.dot_dimension_numbers<[1], [0], [0], [1], [0, 0, 1, 1], [], []>} : vector<128x128xbf16>, vector<128x8xbf16>, vector<128x8xf32> -> vector<128x8xf32>
    %66 = arith.truncf %65 : vector<128x8xf32> to vector<128x8xbf16>
    %c4_46 = arith.constant 4 : index
    %c0_47 = arith.constant 0 : index
    %c0_48 = arith.constant 0 : index
    %67 = vector.load %arg3[%c4_46, %c0_47, %c0_48] : memref<9x8x8xbf16, #tpu.memory_space<vmem>>, vector<1x8x8xbf16>
    %68 = vector.shape_cast %67 : vector<1x8x8xbf16> to vector<8x8xbf16>
    %cst_49 = arith.constant dense<0.000000e+00> : vector<128x8xf32>
    %69 = tpu.matmul %66, %68, %cst_49 {dimension_numbers = #tpu.dot_dimension_numbers<[1], [0], [0], [1], [0, 0, 1, 1], [], []>} : vector<128x8xbf16>, vector<8x8xbf16>, vector<128x8xf32> -> vector<128x8xf32>
    %70 = arith.addf %62, %69 : vector<128x8xf32>
    %c5 = arith.constant 5 : index
    %c0_50 = arith.constant 0 : index
    %c0_51 = arith.constant 0 : index
    %71 = vector.load %arg5[%c5, %c0_50, %c0_51] : memref<9x128x128xbf16, #tpu.memory_space<vmem>>, vector<1x128x128xbf16>
    %72 = vector.shape_cast %71 : vector<1x128x128xbf16> to vector<128x128xbf16>
    %cst_52 = arith.constant dense<0.000000e+00> : vector<128x8xf32>
    %73 = tpu.matmul %72, %29, %cst_52 {dimension_numbers = #tpu.dot_dimension_numbers<[1], [0], [0], [1], [0, 0, 1, 1], [], []>} : vector<128x128xbf16>, vector<128x8xbf16>, vector<128x8xf32> -> vector<128x8xf32>
    %74 = arith.truncf %73 : vector<128x8xf32> to vector<128x8xbf16>
    %c5_53 = arith.constant 5 : index
    %c0_54 = arith.constant 0 : index
    %c0_55 = arith.constant 0 : index
    %75 = vector.load %arg3[%c5_53, %c0_54, %c0_55] : memref<9x8x8xbf16, #tpu.memory_space<vmem>>, vector<1x8x8xbf16>
    %76 = vector.shape_cast %75 : vector<1x8x8xbf16> to vector<8x8xbf16>
    %cst_56 = arith.constant dense<0.000000e+00> : vector<128x8xf32>
    %77 = tpu.matmul %74, %76, %cst_56 {dimension_numbers = #tpu.dot_dimension_numbers<[1], [0], [0], [1], [0, 0, 1, 1], [], []>} : vector<128x8xbf16>, vector<8x8xbf16>, vector<128x8xf32> -> vector<128x8xf32>
    %78 = arith.addf %70, %77 : vector<128x8xf32>
    %c6 = arith.constant 6 : index
    %c0_57 = arith.constant 0 : index
    %c0_58 = arith.constant 0 : index
    %79 = vector.load %arg5[%c6, %c0_57, %c0_58] : memref<9x128x128xbf16, #tpu.memory_space<vmem>>, vector<1x128x128xbf16>
    %80 = vector.shape_cast %79 : vector<1x128x128xbf16> to vector<128x128xbf16>
    %cst_59 = arith.constant dense<0.000000e+00> : vector<128x8xf32>
    %81 = tpu.matmul %80, %29, %cst_59 {dimension_numbers = #tpu.dot_dimension_numbers<[1], [0], [0], [1], [0, 0, 1, 1], [], []>} : vector<128x128xbf16>, vector<128x8xbf16>, vector<128x8xf32> -> vector<128x8xf32>
    %82 = arith.truncf %81 : vector<128x8xf32> to vector<128x8xbf16>
    %c6_60 = arith.constant 6 : index
    %c0_61 = arith.constant 0 : index
    %c0_62 = arith.constant 0 : index
    %83 = vector.load %arg3[%c6_60, %c0_61, %c0_62] : memref<9x8x8xbf16, #tpu.memory_space<vmem>>, vector<1x8x8xbf16>
    %84 = vector.shape_cast %83 : vector<1x8x8xbf16> to vector<8x8xbf16>
    %cst_63 = arith.constant dense<0.000000e+00> : vector<128x8xf32>
    %85 = tpu.matmul %82, %84, %cst_63 {dimension_numbers = #tpu.dot_dimension_numbers<[1], [0], [0], [1], [0, 0, 1, 1], [], []>} : vector<128x8xbf16>, vector<8x8xbf16>, vector<128x8xf32> -> vector<128x8xf32>
    %86 = arith.addf %78, %85 : vector<128x8xf32>
    %c7 = arith.constant 7 : index
    %c0_64 = arith.constant 0 : index
    %c0_65 = arith.constant 0 : index
    %87 = vector.load %arg5[%c7, %c0_64, %c0_65] : memref<9x128x128xbf16, #tpu.memory_space<vmem>>, vector<1x128x128xbf16>
    %88 = vector.shape_cast %87 : vector<1x128x128xbf16> to vector<128x128xbf16>
    %cst_66 = arith.constant dense<0.000000e+00> : vector<128x8xf32>
    %89 = tpu.matmul %88, %29, %cst_66 {dimension_numbers = #tpu.dot_dimension_numbers<[1], [0], [0], [1], [0, 0, 1, 1], [], []>} : vector<128x128xbf16>, vector<128x8xbf16>, vector<128x8xf32> -> vector<128x8xf32>
    %90 = arith.truncf %89 : vector<128x8xf32> to vector<128x8xbf16>
    %c7_67 = arith.constant 7 : index
    %c0_68 = arith.constant 0 : index
    %c0_69 = arith.constant 0 : index
    %91 = vector.load %arg3[%c7_67, %c0_68, %c0_69] : memref<9x8x8xbf16, #tpu.memory_space<vmem>>, vector<1x8x8xbf16>
    %92 = vector.shape_cast %91 : vector<1x8x8xbf16> to vector<8x8xbf16>
    %cst_70 = arith.constant dense<0.000000e+00> : vector<128x8xf32>
    %93 = tpu.matmul %90, %92, %cst_70 {dimension_numbers = #tpu.dot_dimension_numbers<[1], [0], [0], [1], [0, 0, 1, 1], [], []>} : vector<128x8xbf16>, vector<8x8xbf16>, vector<128x8xf32> -> vector<128x8xf32>
    %94 = arith.addf %86, %93 : vector<128x8xf32>
    %c8 = arith.constant 8 : index
    %c0_71 = arith.constant 0 : index
    %c0_72 = arith.constant 0 : index
    %95 = vector.load %arg5[%c8, %c0_71, %c0_72] : memref<9x128x128xbf16, #tpu.memory_space<vmem>>, vector<1x128x128xbf16>
    %96 = vector.shape_cast %95 : vector<1x128x128xbf16> to vector<128x128xbf16>
    %cst_73 = arith.constant dense<0.000000e+00> : vector<128x8xf32>
    %97 = tpu.matmul %96, %29, %cst_73 {dimension_numbers = #tpu.dot_dimension_numbers<[1], [0], [0], [1], [0, 0, 1, 1], [], []>} : vector<128x128xbf16>, vector<128x8xbf16>, vector<128x8xf32> -> vector<128x8xf32>
    %98 = arith.truncf %97 : vector<128x8xf32> to vector<128x8xbf16>
    %c8_74 = arith.constant 8 : index
    %c0_75 = arith.constant 0 : index
    %c0_76 = arith.constant 0 : index
    %99 = vector.load %arg3[%c8_74, %c0_75, %c0_76] : memref<9x8x8xbf16, #tpu.memory_space<vmem>>, vector<1x8x8xbf16>
    %100 = vector.shape_cast %99 : vector<1x8x8xbf16> to vector<8x8xbf16>
    %cst_77 = arith.constant dense<0.000000e+00> : vector<128x8xf32>
    %101 = tpu.matmul %98, %100, %cst_77 {dimension_numbers = #tpu.dot_dimension_numbers<[1], [0], [0], [1], [0, 0, 1, 1], [], []>} : vector<128x8xbf16>, vector<8x8xbf16>, vector<128x8xf32> -> vector<128x8xf32>
    %102 = arith.addf %94, %101 : vector<128x8xf32>
    %c0_78 = arith.constant 0 : index
    %c0_79 = arith.constant 0 : index
    %103 = vector.load %arg8[%c0_78, %c0_79] : memref<1x8xf32, #tpu.memory_space<vmem>>, vector<1x8xf32>
    %c0_80 = arith.constant 0 : index
    %c0_81 = arith.constant 0 : index
    %104 = vector.load %arg9[%c0_80, %c0_81] : memref<1x8xf32, #tpu.memory_space<vmem>>, vector<1x8xf32>
    %cst_82 = arith.constant dense<0.000000e+00> : vector<8xf32>
    %105 = vector.multi_reduction <add>, %102, %cst_82 [0] : vector<128x8xf32> to vector<8xf32>
    %106 = vector.shape_cast %105 : vector<8xf32> to vector<1x8xf32>
    %107 = arith.mulf %102, %102 : vector<128x8xf32>
    %cst_83 = arith.constant dense<0.000000e+00> : vector<8xf32>
    %108 = vector.multi_reduction <add>, %107, %cst_83 [0] : vector<128x8xf32> to vector<8xf32>
    %109 = vector.shape_cast %108 : vector<8xf32> to vector<1x8xf32>
    %cst_84 = arith.constant 7.812500e-03 : f32
    %110 = vector.broadcast %cst_84 : f32 to vector<1x8xf32>
    %111 = arith.mulf %106, %110 : vector<1x8xf32>
    %cst_85 = arith.constant 7.812500e-03 : f32
    %112 = vector.broadcast %cst_85 : f32 to vector<1x8xf32>
    %113 = arith.mulf %109, %112 : vector<1x8xf32>
    %114 = arith.mulf %111, %111 : vector<1x8xf32>
    %115 = arith.subf %113, %114 : vector<1x8xf32>
    %cst_86 = arith.constant 9.99999974E-6 : f32
    %116 = vector.broadcast %cst_86 : f32 to vector<1x8xf32>
    %117 = arith.addf %115, %116 : vector<1x8xf32>
    %118 = math.rsqrt %117 : vector<1x8xf32>
    %119 = arith.mulf %103, %118 : vector<1x8xf32>
    %120 = arith.mulf %111, %119 : vector<1x8xf32>
    %121 = arith.subf %104, %120 : vector<1x8xf32>
    %122 = vector.broadcast %119 : vector<1x8xf32> to vector<128x8xf32>
    %123 = arith.mulf %102, %122 : vector<128x8xf32>
    %124 = vector.broadcast %121 : vector<1x8xf32> to vector<128x8xf32>
    %125 = arith.addf %123, %124 : vector<128x8xf32>
    %cst_87 = arith.constant 0.000000e+00 : f32
    %126 = vector.broadcast %cst_87 : f32 to vector<128x8xf32>
    %127 = arith.maximumf %125, %126 : vector<128x8xf32>
    %128 = arith.truncf %127 : vector<128x8xf32> to vector<128x8xbf16>
    %c0_88 = arith.constant 0 : index
    %c0_89 = arith.constant 0 : index
    %129 = vector.load %arg4[%c0_88, %c0_89] : memref<8x16xbf16, #tpu.memory_space<vmem>>, vector<8x16xbf16>
    %cst_90 = arith.constant dense<0.000000e+00> : vector<128x16xf32>
    %130 = tpu.matmul %128, %129, %cst_90 {dimension_numbers = #tpu.dot_dimension_numbers<[1], [0], [0], [1], [0, 0, 1, 1], [], []>} : vector<128x8xbf16>, vector<8x16xbf16>, vector<128x16xf32> -> vector<128x16xf32>
    %c0_91 = arith.constant 0 : index
    %c0_92 = arith.constant 0 : index
    %131 = vector.load %arg10[%c0_91, %c0_92] : memref<1x16xf32, #tpu.memory_space<vmem>>, vector<1x16xf32>
    %c0_93 = arith.constant 0 : index
    %c0_94 = arith.constant 0 : index
    %132 = vector.load %arg11[%c0_93, %c0_94] : memref<1x16xf32, #tpu.memory_space<vmem>>, vector<1x16xf32>
    %cst_95 = arith.constant dense<0.000000e+00> : vector<16xf32>
    %133 = vector.multi_reduction <add>, %130, %cst_95 [0] : vector<128x16xf32> to vector<16xf32>
    %134 = vector.shape_cast %133 : vector<16xf32> to vector<1x16xf32>
    %135 = arith.mulf %130, %130 : vector<128x16xf32>
    %cst_96 = arith.constant dense<0.000000e+00> : vector<16xf32>
    %136 = vector.multi_reduction <add>, %135, %cst_96 [0] : vector<128x16xf32> to vector<16xf32>
    %137 = vector.shape_cast %136 : vector<16xf32> to vector<1x16xf32>
    %cst_97 = arith.constant 7.812500e-03 : f32
    %138 = vector.broadcast %cst_97 : f32 to vector<1x16xf32>
    %139 = arith.mulf %134, %138 : vector<1x16xf32>
    %cst_98 = arith.constant 7.812500e-03 : f32
    %140 = vector.broadcast %cst_98 : f32 to vector<1x16xf32>
    %141 = arith.mulf %137, %140 : vector<1x16xf32>
    %142 = arith.mulf %139, %139 : vector<1x16xf32>
    %143 = arith.subf %141, %142 : vector<1x16xf32>
    %cst_99 = arith.constant 9.99999974E-6 : f32
    %144 = vector.broadcast %cst_99 : f32 to vector<1x16xf32>
    %145 = arith.addf %143, %144 : vector<1x16xf32>
    %146 = math.rsqrt %145 : vector<1x16xf32>
    %147 = arith.mulf %131, %146 : vector<1x16xf32>
    %148 = arith.mulf %139, %147 : vector<1x16xf32>
    %149 = arith.subf %132, %148 : vector<1x16xf32>
    %150 = vector.broadcast %147 : vector<1x16xf32> to vector<128x16xf32>
    %151 = arith.mulf %130, %150 : vector<128x16xf32>
    %152 = vector.broadcast %149 : vector<1x16xf32> to vector<128x16xf32>
    %153 = arith.addf %151, %152 : vector<128x16xf32>
    %154 = arith.addf %153, %0 : vector<128x16xf32>
    %cst_100 = arith.constant 0.000000e+00 : f32
    %155 = vector.broadcast %cst_100 : f32 to vector<128x16xf32>
    %156 = arith.maximumf %154, %155 : vector<128x16xf32>
    %c0_101 = arith.constant 0 : index
    %c0_102 = arith.constant 0 : index
    %157 = vector.load %arg12[%c0_101, %c0_102] : memref<128x16xf32, #tpu.memory_space<vmem>>, vector<128x16xf32>
    tpu.vector_store %arg12[%c0_101, %c0_102], %156 {strides = array<i32>} : memref<128x16xf32, #tpu.memory_space<vmem>>, vector<128x16xf32>,
    return
  }
  func.func @transform_0(%arg0: i32) -> (i32, i32) {
    %c0_i32 = arith.constant 0 : i32
    %c0_i32_0 = arith.constant 0 : i32
    %c0_i32_1 = arith.constant 0 : i32
    return %c0_i32, %c0_i32_0 : i32, i32
  }
  func.func @transform_1(%arg0: i32) -> (i32, i32) {
    %c0_i32 = arith.constant 0 : i32
    %c0_i32_0 = arith.constant 0 : i32
    %c0_i32_1 = arith.constant 0 : i32
    return %c0_i32, %c0_i32_0 : i32, i32
  }
  func.func @transform_2(%arg0: i32) -> (i32, i32, i32) {
    %c0_i32 = arith.constant 0 : i32
    %c0_i32_0 = arith.constant 0 : i32
    %c0_i32_1 = arith.constant 0 : i32
    %c0_i32_2 = arith.constant 0 : i32
    return %c0_i32, %c0_i32_0, %c0_i32_1 : i32, i32, i32
  }
  func.func @transform_3(%arg0: i32) -> (i32, i32) {
    %c0_i32 = arith.constant 0 : i32
    %c0_i32_0 = arith.constant 0 : i32
    %c0_i32_1 = arith.constant 0 : i32
    return %c0_i32, %c0_i32_0 : i32, i32
  }
  func.func @transform_4(%arg0: i32) -> (i32, i32, i32) {
    %c0_i32 = arith.constant 0 : i32
    %c0_i32_0 = arith.constant 0 : i32
    %c0_i32_1 = arith.constant 0 : i32
    %c0_i32_2 = arith.constant 0 : i32
    return %c0_i32, %c0_i32_0, %c0_i32_1 : i32, i32, i32
  }
  func.func @transform_5(%arg0: i32) -> (i32, i32) {
    %c0_i32 = arith.constant 0 : i32
    %c0_i32_0 = arith.constant 0 : i32
    %c0_i32_1 = arith.constant 0 : i32
    return %c0_i32, %c0_i32_0 : i32, i32
  }
  func.func @transform_6(%arg0: i32) -> (i32, i32) {
    %c0_i32 = arith.constant 0 : i32
    %c0_i32_0 = arith.constant 0 : i32
    %c0_i32_1 = arith.constant 0 : i32
    return %c0_i32, %c0_i32_0 : i32, i32
  }
  func.func @transform_7(%arg0: i32) -> (i32, i32) {
    %c0_i32 = arith.constant 0 : i32
    %c0_i32_0 = arith.constant 0 : i32
    %c0_i32_1 = arith.constant 0 : i32
    return %c0_i32, %c0_i32_0 : i32, i32
  }
  func.func @transform_8(%arg0: i32) -> (i32, i32) {
    %c0_i32 = arith.constant 0 : i32
    %c0_i32_0 = arith.constant 0 : i32
    %c0_i32_1 = arith.constant 0 : i32
    return %c0_i32, %c0_i32_0 : i32, i32
  }
  func.func @transform_9(%arg0: i32) -> (i32, i32) {
    %c0_i32 = arith.constant 0 : i32
    %c0_i32_0 = arith.constant 0 : i32
    %c0_i32_1 = arith.constant 0 : i32
    return %c0_i32, %c0_i32_0 : i32, i32
  }
  func.func @transform_10(%arg0: i32) -> (i32, i32) {
    %c0_i32 = arith.constant 0 : i32
    %c0_i32_0 = arith.constant 0 : i32
    %c0_i32_1 = arith.constant 0 : i32
    return %c0_i32, %c0_i32_0 : i32, i32
  }
  func.func @transform_11(%arg0: i32) -> (i32, i32) {
    %c0_i32 = arith.constant 0 : i32
    %c0_i32_0 = arith.constant 0 : i32
    %c0_i32_1 = arith.constant 0 : i32
    return %c0_i32, %c0_i32_0 : i32, i32
  }
}

</mosaic_0001>

<bundles_post_ra>
// kernel: tpu_custom_call.1
= control target key start
LH: loop header
LB: loop body
LE: loop exit
PB: predicated region body
PF: predicated region fallthrough
CT: control target
= control target key end

     0   :  { %16 = vsyncpa [#allocation3], 0  ;;  %s4688_s17 = smov [#allocation2]   ;;  %s5759_s0 = inlined_call_operand.vmem [shape: f32[128,16], index: 0, kind: input, shape index: {}]   ;;  %s5760_s1 = inlined_call_operand.vmem [shape: bf16[16,8], index: 1, kind: input, shape index: {}]   ;;  %s5761_s2 = inlined_call_operand.vmem [shape: bf16[9,8,8], index: 2, kind: input, shape index: {}]   ;;  %s5762_s3 = inlined_call_operand.vmem [shape: bf16[8,16], index: 3, kind: input, shape index: {}]   ;;  %s5763_s4 = inlined_call_operand.hbm [shape: bf16[9,128,128], index: 4, kind: input, shape index: {}]   ;;  %s5764_s5 = inlined_call_operand.vmem [shape: f32[1,8], index: 5, kind: input, shape index: {}]   ;;  %s5765_s6 = inlined_call_operand.vmem [shape: f32[1,8], index: 6, kind: input, shape index: {}]   ;;  %s5766_s7 = inlined_call_operand.vmem [shape: f32[1,8], index: 7, kind: input, shape index: {}]   ;;  %s5767_s8 = inlined_call_operand.vmem [shape: f32[1,8], index: 8, kind: input, shape index: {}]   ;;  %s5768_s9 = inlined_call_operand.vmem [shape: f32[1,16], index: 9, kind: input, shape index: {}]   ;;  %s5769_s10 = inlined_call_operand.vmem [shape: f32[1,16], index: 10, kind: input, shape index: {}]   ;;  %s5770_s11 = inlined_call_operand.vmem [shape: f32[128,16], index: 11, kind: output, shape index: {}]  }
   0x1   :  { %s30_s18 = sshll.u32 %s4688_s17, 4  ;;  %s31_s18 = int_to_ptr.vmem [resolvable:$true] %s30_s18 }
   0x2   :  { %s4674_s19 = scalar_lea.vmem %s31_s18, 9216  ;;  %p4679_p1 = scmp.lt.s32.totalorder %s31_s18, %s31_s18 }
   0x3   :  { %p4675_p0 = scmp.ne.s32.totalorder %s31_s18, %s4674_s19  ;;  %p4680_p2 = scmp.lt.s32.totalorder %s4674_s19, %s4674_s19 }
   0x5   :  { %p4681_p3 = por %p4680_p2, %p4679_p1 }
   0x7   :  { %p4682_p4 = pnand %p4681_p3, %p4675_p0 }
   0x9   :  { %4685 = shalt.err (!%p4682_p4)
}
   0xa   :  { %s4689_s20 = smov 64   ;;  %s4690_s21 = smov 4  }
   0xb   :  { %36 = dma.hbm_to_vmem [thread:$0]  %s5763_s4, 9216, %s31_s18, [#allocation3], %s4689_s20, %s4689_s20, %s4690_s21  }
   0xc   :  { %4686 = dma.done.wait [#allocation3], 9216  }
   0xd   :  { %4687 = vsyncadd [#allocation3], 4294958080  ;;  %v4571_v0 = vld [vmem:[%s5760_s1] sm:$0xff]   ;;  %v54_v2 = vld [vmem:[%s5759_s0 + $0x8] sm:$0xff]  ;;  %vm85_vm0 = vcmask 130048   ;;  %vm209_vm1 = vcmask 64512  }
   0xe   :  { %v53_v1 = vld [vmem:[%s5759_s0] sm:$0xff]  ;;  %v55_v3 = vld [vmem:[%s5759_s0 + $0x10] sm:$0xff]  ;;  %4056 = vmatprep.subr.bf16.mxu0 %v4571_v0  ;;  %v56_v5 = vld [vmem:[%s5759_s0 + $0x18] sm:$0xff]  ;;  %vm743_vm2 = vcmask 1043456  }
   0xf   :  { %v69_v4 = vpack.c.bf16 %v54_v2, %v53_v1  ;;  %v57_v6 = vld [vmem:[%s5759_s0 + $0x20] sm:$0xff]  ;;  %v58_v7 = vld [vmem:[%s5759_s0 + $0x28] sm:$0xff]  ;;  %4057 = vmatpush3.bf16.msra.mxu0 %v4571_v0  ;;  %v70_v8 = vpack.c.bf16 %v56_v5, %v55_v3  ;;  %v59_v10 = vld [vmem:[%s5759_s0 + $0x30] sm:$0xff] }
  0x10   :  { %v71_v9 = vpack.c.bf16 %v58_v7, %v57_v6  ;;  %v60_v11 = vld [vmem:[%s5759_s0 + $0x38] sm:$0xff]  ;;  %v61_v12 = vld [vmem:[%s5759_s0 + $0x40] sm:$0xff]  ;;  %v62_v13 = vld [vmem:[%s5759_s0 + $0x48] sm:$0xff] }
  0x11   :  { %4058 = vmatprep.mubr.msk.bf16.mxu0 %vm85_vm0, %v69_v4  ;;  %v72_v14 = vpack.c.bf16 %v60_v11, %v59_v10  ;;  %v73_v15 = vpack.c.bf16 %v62_v13, %v61_v12  ;;  %v63_v16 = vld [vmem:[%s5759_s0 + $0x50] sm:$0xff]  ;;  %v64_v17 = vld [vmem:[%s5759_s0 + $0x58] sm:$0xff]  ;;  %v65_v18 = vld [vmem:[%s5759_s0 + $0x60] sm:$0xff] }
  0x12   :  { %4059 = vmatmul.mubr.msk.bf16.vlgmr.msra.gmra.mxu0 %vm85_vm0, %v70_v8  ;;  %v66_v19 = vld [vmem:[%s5759_s0 + $0x68] sm:$0xff]  ;;  %v74_v20 = vpack.c.bf16 %v64_v17, %v63_v16  ;;  %v67_v22 = vld [vmem:[%s5759_s0 + $0x70] sm:$0xff]  ;;  %v68_v23 = vld [vmem:[%s5759_s0 + $0x78] sm:$0xff] }
  0x13   :  { %4062 = vmatprep.mubr.msk.bf16.mxu0 %vm85_vm0, %v71_v9  ;;  %v75_v21 = vpack.c.bf16 %v66_v19, %v65_v18  ;;  %v76_v24 = vpack.c.bf16 %v68_v23, %v67_v22  ;;  %v4572_v25 = vld [vmem:[#allocation2] sm:$0xff]  }
  0x14   :  { %v4573_v26 = vld [vmem:[#allocation2 + $0x40] sm:$0xff]   ;;  %4090 = vmatprep.mubr.bf16.mxu1 %v4572_v25 }
  0x1a   :  { %4063 = vmatmul.mubr.msk.bf16.gmra.mxu0 %vm85_vm0, %v72_v14 }
  0x1b   :  { %4066 = vmatprep.mubr.msk.bf16.mxu0 %vm85_vm0, %v73_v15 }
  0x22   :  { %4067 = vmatmul.mubr.msk.bf16.gmra.mxu0 %vm85_vm0, %v74_v20 }
  0x23   :  { %4070 = vmatprep.mubr.msk.bf16.mxu0 %vm85_vm0, %v75_v21 }
  0x2a   :  { %4071 = vmatmul.mubr.msk.bf16.gmra.mxu0 %vm85_vm0, %v76_v24 }
  0x2b   :  { %4122 = vmatprep.mubr.bf16.mxu0 %v4573_v26 }
  0xd2   :  { %v4813_v27 = vpop.f32.mrf.mxu0 }
  0xd3   :  { %v249_v32 = vmul.f32 %v4813_v27, %v4813_v27  ;;  %v213_v38 = vsel %vm209_vm1, %v4813_v27, 0.0 }
  0xd4   :  { %v4815_v28 = vpop.f32.mrf.mxu0 }
  0xd5   :  { %v247_v30 = vmul.f32 %v4815_v28, %v4815_v28  ;;  %v210_v33 = vsel %vm209_vm1, %v4815_v28, 0.0  ;;  %v266_v45 = vsel %vm209_vm1, %v249_v32, 0.0 }
  0xd6   :  { %v4817_v29 = vpop.f32.mrf.mxu0 }
  0xd7   :  { %v263_v39 = vsel %vm209_vm1, %v247_v30, 0.0  ;;  %v250_v40 = vmul.f32 %v4817_v29, %v4817_v29  ;;  %v215_v46 = vsel %vm209_vm1, %v4817_v29, 0.0 }
  0xd8   :  { %v4821_v31 = vpop.f32.mrf.mxu0 }
  0xd9   :  { %v211_v34 = vsel %vm209_vm1, %v4821_v31, 0.0  ;;  %v248_v35 = vmul.f32 %v4821_v31, %v4821_v31  ;;  %v268_v51 = vsel %vm209_vm1, %v250_v40, 0.0 }
  0xda   :  { %v212_v36 = vadd.f32 %v211_v34, %v210_v33  ;;  %v4831_v37 = vpop.f32.mrf.mxu0 }
  0xdb   :  { %v264_v41 = vsel %vm209_vm1, %v248_v35, 0.0  ;;  %v253_v56 = vmul.f32 %v4831_v37, %v4831_v37  ;;  %v221_v63 = vsel %vm209_vm1, %v4831_v37, 0.0 }
  0xdc   :  { %v265_v42 = vadd.f32 %v264_v41, %v263_v39  ;;  %v4839_v43 = vpop.f32.mrf.mxu0  ;;  %v214_v44 = vadd.f32 %v213_v38, %v212_v36 }
  0xdd   :  { %v251_v47 = vmul.f32 %v4839_v43, %v4839_v43  ;;  %v217_v52 = vsel %vm209_vm1, %v4839_v43, 0.0  ;;  %v274_v5 = vsel %vm209_vm1, %v253_v56, 0.0 }
  0xde   :  { %v216_v48 = vadd.f32 %v215_v46, %v214_v44  ;;  %v267_v49 = vadd.f32 %v266_v45, %v265_v42  ;;  %v4846_v50 = vpop.f32.mrf.mxu0 }
  0xdf   :  { %v270_v57 = vsel %vm209_vm1, %v251_v47, 0.0  ;;  %v254_v0 = vmul.f32 %v4846_v50, %v4846_v50  ;;  %v223_v6 = vsel %vm209_vm1, %v4846_v50, 0.0 }
  0xe0   :  { %v218_v53 = vadd.f32 %v217_v52, %v216_v48  ;;  %v269_v54 = vadd.f32 %v268_v51, %v267_v49  ;;  %v4851_v55 = vpop.f32.mrf.mxu0 }
  0xe1   :  { %v219_v58 = vsel %vm209_vm1, %v4851_v55, 0.0  ;;  %v252_v59 = vmul.f32 %v4851_v55, %v4851_v55  ;;  %v276_v11 = vsel %vm209_vm1, %v254_v0, 0.0 }
  0xe2   :  { %v271_v60 = vadd.f32 %v270_v57, %v269_v54  ;;  %v220_v61 = vadd.f32 %v219_v58, %v218_v53  ;;  %v4860_v62 = vpop.f32.mrf.mxu0 }
  0xe3   :  { %v272_v1 = vsel %vm209_vm1, %v252_v59, 0.0  ;;  %v257_v16 = vmul.f32 %v4860_v62, %v4860_v62  ;;  %v229_v23 = vsel %vm209_vm1, %v4860_v62, 0.0 }
  0xe4   :  { %v273_v2 = vadd.f32 %v272_v1, %v271_v60  ;;  %v4867_v3 = vpop.f32.mrf.mxu0  ;;  %v222_v4 = vadd.f32 %v221_v63, %v220_v61 }
  0xe5   :  { %v255_v7 = vmul.f32 %v4867_v3, %v4867_v3  ;;  %v225_v12 = vsel %vm209_vm1, %v4867_v3, 0.0  ;;  %v282_v33 = vsel %vm209_vm1, %v257_v16, 0.0 }
  0xe6   :  { %v224_v8 = vadd.f32 %v223_v6, %v222_v4  ;;  %v275_v9 = vadd.f32 %v274_v5, %v273_v2  ;;  %v4874_v10 = vpop.f32.mrf.mxu0 }
  0xe7   :  { %v278_v17 = vsel %vm209_vm1, %v255_v7, 0.0  ;;  %v258_v24 = vmul.f32 %v4874_v10, %v4874_v10  ;;  %v231_v34 = vsel %vm209_vm1, %v4874_v10, 0.0 }
  0xe8   :  { %v226_v13 = vadd.f32 %v225_v12, %v224_v8  ;;  %v277_v14 = vadd.f32 %v276_v11, %v275_v9  ;;  %v4879_v15 = vpop.f32.mrf.mxu0 }
  0xe9   :  { %v227_v18 = vsel %vm209_vm1, %v4879_v15, 0.0  ;;  %v256_v19 = vmul.f32 %v4879_v15, %v4879_v15  ;;  %v284_v40 = vsel %vm209_vm1, %v258_v24, 0.0  ;;  %v207_v24 = vld [vmem:[%s5764_s5] sm:$0x1] }
  0xea   :  { %v279_v20 = vadd.f32 %v278_v17, %v277_v14  ;;  %v228_v21 = vadd.f32 %v227_v18, %v226_v13  ;;  %v4888_v22 = vpop.f32.mrf.mxu0 }
  0xeb   :  { %v280_v25 = vsel %vm209_vm1, %v256_v19, 0.0  ;;  %v261_v46 = vmul.f32 %v4888_v22, %v4888_v22  ;;  %v237_v53 = vsel %vm209_vm1, %v4888_v22, 0.0 }
  0xec   :  { %v281_v26 = vadd.f32 %v280_v25, %v279_v20  ;;  %v192_v30 = vpop.f32.mrf.mxu0  ;;  %v230_v32 = vadd.f32 %v229_v23, %v228_v21  ;;  %v310_v23 = vlaneseq }
  0xed   :  { %v259_v35 = vmul.f32 %v192_v30, %v192_v30  ;;  %v233_v41 = vsel %vm209_vm1, %v192_v30, 0.0  ;;  %v290_v59 = vsel %vm209_vm1, %v261_v46, 0.0 }
  0xee   :  { %v232_v36 = vadd.f32 %v231_v34, %v230_v32  ;;  %v283_v38 = vadd.f32 %v282_v33, %v281_v26  ;;  %v4073_v39 = vpop.f32.mrf.mxu0  ;;  %v311_v26 = vshrl.u32 %v310_v23, 7  ;;  %v208_v33 = vld [vmem:[%s5765_s6] sm:$0x1] }
  0xef   :  { %v286_v47 = vsel %vm209_vm1, %v259_v35, 0.0  ;;  %v262_v54 = vmul.f32 %v4073_v39, %v4073_v39  ;;  %v239_v60 = vsel %vm209_vm1, %v4073_v39, 0.0 }
  0xf0   :  { %v234_v42 = vadd.f32 %v233_v41, %v232_v36  ;;  %v285_v44 = vadd.f32 %v284_v40, %v283_v38  ;;  %v195_v45 = vpop.f32.mrf.mxu0  ;;  %v4916_v35 = vsub.s32 0, %v311_v26  ;;  %v3669_v26 = vld [vmem:[%s5761_s2 + $0x4] sm:$0xf] }
  0xf1   :  { %v235_v48 = vsel %vm209_vm1, %v195_v45, 0.0  ;;  %v260_v49 = vmul.f32 %v195_v45, %v195_v45  ;;  %v292_v0 = vsel %vm209_vm1, %v262_v54, 0.0 }
  0xf2   :  { %v287_v51 = vadd.f32 %v286_v47, %v285_v44  ;;  %v236_v52 = vadd.f32 %v235_v48, %v234_v42 }
  0xf3   :  { %v288_v56 = vsel %vm209_vm1, %v260_v49, 0.0 }
  0xf4   :  { %v238_v57 = vadd.f32 %v237_v53, %v236_v52  ;;  %v289_v58 = vadd.f32 %v288_v56, %v287_v51 }
  0xf6   :  { %v240_v61 = vadd.f32 %v239_v60, %v238_v57  ;;  %v291_v63 = vadd.f32 %v290_v59, %v289_v58 }
  0xf8   :  { %v241_v1 = vrot.slane %v240_v61, 4  ;;  %v293_v2 = vadd.f32 %v292_v0, %v291_v63 }
  0xfa   :  { %v242_v4 = vadd.f32 %v241_v1, %v240_v61  ;;  %v294_v5 = vrot.slane %v293_v2, 4 }
  0xfc   :  { %v243_v6 = vrot.slane %v242_v4, 2  ;;  %v295_v7 = vadd.f32 %v294_v5, %v293_v2 }
  0xfe   :  { %v244_v8 = vadd.f32 %v243_v6, %v242_v4  ;;  %v296_v9 = vrot.slane %v295_v7, 2 }
 0x100   :  { %v245_v11 = vrot.slane %v244_v8, 1  ;;  %v297_v12 = vadd.f32 %v296_v9, %v295_v7 }
 0x102   :  { %v246_v13 = vadd.f32 %v245_v11, %v244_v8  ;;  %v298_v14 = vrot.slane %v297_v12, 1 }
 0x104   :  { %v299_v16 = vadd.f32 %v298_v14, %v297_v12  ;;  %v300_v17 = vmul.f32 0.0078125, %v246_v13 }
 0x106   :  { %v301_v18 = vmul.f32 0.0078125, %v299_v16  ;;  %v302_v19 = vmul.f32 %v300_v17, %v300_v17 }
 0x108   :  { %v303_v20 = vsub.f32 %v301_v18, %v302_v19 }
 0x10a   :  { %v304_v21 = vadd.f32 1e-05, %v303_v20 }
 0x10c   :  { %4644 = vrsqrt.f32 %v304_v21 }
 0x119   :  { %v4645_v25 = vpop.eup %4644 }
 0x11a   :  { %v306_v32 = vmul.f32 %v4645_v25, %v207_v24 }
 0x11c   :  { %v307_v34 = vmul.f32 %v306_v32, %v300_v17  ;;  %v4919_v38 = vrot.slane %v306_v32, %v4916_v35  ;;  %v4574_v32 = vld [vmem:[#allocation2 + $0x8] sm:$0xff]  }
 0x11e   :  { %v308_v36 = vsub.f32 %v208_v33, %v307_v34  ;;  %v327_v41 = vmul.f32 %v4919_v38, %v192_v30  ;;  %v328_v42 = vmul.f32 %v4919_v38, %v195_v45  ;;  %v329_v44 = vmul.f32 %v4888_v22, %v4919_v38  ;;  %v4575_v33 = vld [vmem:[#allocation2 + $0x48] sm:$0xff]   ;;  %v4576_v34 = vld [vmem:[#allocation2 + $0x10] sm:$0xff]  }
 0x11f   :  { %v330_v46 = vmul.f32 %v4073_v39, %v4919_v38  ;;  %v325_v52 = vmul.f32 %v4860_v62, %v4919_v38  ;;  %v326_v30 = vmul.f32 %v4874_v10, %v4919_v38  ;;  %v323_v57 = vmul.f32 %v4919_v38, %v4867_v3 }
 0x120   :  { %v4922_v40 = vrot.slane %v308_v36, %v4916_v35  ;;  %v324_v58 = vmul.f32 %v4919_v38, %v4879_v15  ;;  %v321_v3 = vmul.f32 %v4831_v37, %v4919_v38  ;;  %v322_v15 = vmul.f32 %v4846_v50, %v4919_v38 }
 0x121   :  { %v319_v37 = vmul.f32 %v4919_v38, %v4839_v43  ;;  %v320_v50 = vmul.f32 %v4919_v38, %v4851_v55  ;;  %v317_v43 = vmul.f32 %v4813_v27, %v4919_v38  ;;  %v318_v55 = vmul.f32 %v4817_v29, %v4919_v38 }
 0x122   :  { %v349_v47 = vadd.f32 %v4922_v40, %v327_v41  ;;  %v350_v48 = vadd.f32 %v4922_v40, %v328_v42  ;;  %v351_v49 = vadd.f32 %v4922_v40, %v329_v44  ;;  %v352_v51 = vadd.f32 %v4922_v40, %v330_v46  ;;  %v4579_v41 = vld [vmem:[#allocation2 + $0x58] sm:$0xff]   ;;  %v4580_v42 = vld [vmem:[#allocation2 + $0x20] sm:$0xff]   ;;  %v4582_v46 = vld [vmem:[#allocation2 + $0x28] sm:$0xff]  }
 0x123   :  { %v347_v45 = vadd.f32 %v4922_v40, %v325_v52  ;;  %v348_v22 = vadd.f32 %v4922_v40, %v326_v30  ;;  %v345_v62 = vadd.f32 %v4922_v40, %v323_v57  ;;  %v346_v10 = vadd.f32 %v4922_v40, %v324_v58  ;;  %v4581_v44 = vld [vmem:[#allocation2 + $0x60] sm:$0xff]   ;;  %v4587_v52 = vld [vmem:[#allocation2 + $0x78] sm:$0xff]  }
 0x124   :  { %v365_v53 = vmax.f32 %v349_v47, 0.0  ;;  %v366_v39 = vmax.f32 %v350_v48, 0.0  ;;  %v367_v54 = vmax.f32 %v351_v49, 0.0  ;;  %v368_v56 = vmax.f32 %v352_v51, 0.0  ;;  %v4583_v47 = vld [vmem:[#allocation2 + $0x68] sm:$0xff]   ;;  %v4584_v48 = vld [vmem:[#allocation2 + $0x30] sm:$0xff]  }
 0x125   :  { %v363_v60 = vmax.f32 %v347_v45, 0.0  ;;  %v364_v61 = vmax.f32 %v348_v22, 0.0  ;;  %v343_v0 = vadd.f32 %v4922_v40, %v321_v3  ;;  %v344_v1 = vadd.f32 %v4922_v40, %v322_v15  ;;  %v4585_v49 = vld [vmem:[#allocation2 + $0x70] sm:$0xff]   ;;  %v4586_v51 = vld [vmem:[#allocation2 + $0x38] sm:$0xff]   ;;  %v546_v30 = vld [vmem:[%s5761_s2] sm:$0xf] }
 0x126   :  { %v4943_v59 = vpack.c.bf16 %v368_v56, %v367_v54  ;;  %v4947_v63 = vpack.c.bf16 %v366_v39, %v365_v53  ;;  %v361_v2 = vmax.f32 %v345_v62, 0.0  ;;  %v362_v4 = vmax.f32 %v346_v10, 0.0 }
 0x127   :  { %v4961_v5 = vpack.c.bf16 %v364_v61, %v363_v60  ;;  %v341_v6 = vadd.f32 %v4922_v40, %v319_v37  ;;  %v342_v7 = vadd.f32 %v4922_v40, %v320_v50  ;;  %v359_v8 = vmax.f32 %v343_v0, 0.0 }
 0x128   :  { %4074 = vmatprep.subr.bf16.mxu1 %v4943_v59  ;;  %4106 = vmatprep.subr.bf16.mxu0 %v4943_v59  ;;  %v360_v9 = vmax.f32 %v344_v1, 0.0  ;;  %v4973_v11 = vpack.c.bf16 %v362_v4, %v361_v2  ;;  %v339_v12 = vadd.f32 %v4922_v40, %v317_v43  ;;  %v340_v13 = vadd.f32 %v4922_v40, %v318_v55 }
 0x129   :  { %4075 = vmatpush3.bf16.msra.mxu1 %v4943_v59  ;;  %4107 = vmatpush3.bf16.msra.mxu0 %v4943_v59  ;;  %v357_v14 = vmax.f32 %v341_v6, 0.0  ;;  %v358_v16 = vmax.f32 %v342_v7, 0.0  ;;  %v315_v27 = vmul.f32 %v4919_v38, %v4815_v28  ;;  %v316_v29 = vmul.f32 %v4919_v38, %v4821_v31  ;;  %v4577_v38 = vld [vmem:[#allocation2 + $0x50] sm:$0xff]  }
 0x12a   :  { %4076 = vmatprep.subr.bf16.mxu1 %v4947_v63  ;;  %4108 = vmatprep.subr.bf16.mxu0 %v4947_v63  ;;  %v4985_v17 = vpack.c.bf16 %v360_v9, %v359_v8  ;;  %v355_v20 = vmax.f32 %v339_v12, 0.0  ;;  %v356_v21 = vmax.f32 %v340_v13, 0.0  ;;  %v745_v36 = vsel %vm743_vm2, %v3669_v26, 0 }
 0x12b   :  { %v337_v18 = vadd.f32 %v4922_v40, %v315_v27  ;;  %v338_v19 = vadd.f32 %v4922_v40, %v316_v29  ;;  %v4997_v23 = vpack.c.bf16 %v358_v16, %v357_v14  ;;  %v4578_v40 = vld [vmem:[#allocation2 + $0x18] sm:$0xff]   ;;  %v869_v45 = vsel %vm743_vm2, %v546_v30, 0 }
 0x12c   :  { %v5003_v24 = vpack.c.bf16 %v356_v21, %v355_v20 }
 0x12d   :  { %4077 = vmatpush3.bf16.msra.mxu1 %v4947_v63  ;;  %4109 = vmatpush3.bf16.msra.mxu0 %v4947_v63  ;;  %v353_v28 = vmax.f32 %v337_v18, 0.0  ;;  %v354_v31 = vmax.f32 %v338_v19, 0.0 }
 0x12e   :  { %4078 = vmatprep.subr.bf16.mxu1 %v4961_v5  ;;  %4110 = vmatprep.subr.bf16.mxu0 %v4961_v5 }
 0x12f   :  { %v5009_v25 = vpack.c.bf16 %v354_v31, %v353_v28 }
 0x131   :  { %4079 = vmatpush3.bf16.msra.mxu1 %v4961_v5  ;;  %4111 = vmatpush3.bf16.msra.mxu0 %v4961_v5 }
 0x132   :  { %4080 = vmatprep.subr.bf16.mxu1 %v4973_v11  ;;  %4112 = vmatprep.subr.bf16.mxu0 %v4973_v11 }
 0x135   :  { %4081 = vmatpush3.bf16.msra.mxu1 %v4973_v11  ;;  %4113 = vmatpush3.bf16.msra.mxu0 %v4973_v11 }
 0x136   :  { %4082 = vmatprep.subr.bf16.mxu1 %v4985_v17  ;;  %4114 = vmatprep.subr.bf16.mxu0 %v4985_v17 }
 0x139   :  { %4083 = vmatpush3.bf16.msra.mxu1 %v4985_v17  ;;  %4115 = vmatpush3.bf16.msra.mxu0 %v4985_v17 }
 0x13a   :  { %4084 = vmatprep.subr.bf16.mxu1 %v4997_v23  ;;  %4116 = vmatprep.subr.bf16.mxu0 %v4997_v23 }
 0x13d   :  { %4085 = vmatpush3.bf16.msra.mxu1 %v4997_v23  ;;  %4117 = vmatpush3.bf16.msra.mxu0 %v4997_v23 }
 0x13e   :  { %4086 = vmatprep.subr.bf16.mxu1 %v5003_v24  ;;  %4118 = vmatprep.subr.bf16.mxu0 %v5003_v24 }
 0x141   :  { %4087 = vmatpush3.bf16.msra.mxu1 %v5003_v24  ;;  %4119 = vmatpush3.bf16.msra.mxu0 %v5003_v24 }
 0x142   :  { %4088 = vmatprep.subr.bf16.mxu1 %v5009_v25  ;;  %4120 = vmatprep.subr.bf16.mxu0 %v5009_v25 }
 0x145   :  { %4089 = vmatpush3.bf16.msra.mxu1 %v5009_v25  ;;  %4121 = vmatpush3.bf16.msra.mxu0 %v5009_v25 }
 0x146   :  { %4558 = vmatprep.subr.msk.bf16.mxu1 %vm743_vm2, %v3669_v26  ;;  %4559 = vmatprep.subr.msk.bf16.mxu0 %vm743_vm2, %v546_v30  ;;  %v4593_v30 = vld [vmem:[#allocation2 + $0xa8] sm:$0xff]  }
 0x148   :  { %4091 = vmatmul.mubr.bf16.vlgmr.msra.gmra.mxu1 %v4574_v32  ;;  %4123 = vmatmul.mubr.bf16.vlgmr.msra.gmra.mxu0 %v4575_v33 }
 0x149   :  { %4139 = vmatpush3.bf16.msra.mxu1 %v745_v36  ;;  %4094 = vmatprep.mubr.bf16.mxu1 %v4576_v34 }
 0x14a   :  { %4174 = vmatprep.subr.bf16.mxu1 %v4943_v59  ;;  %4126 = vmatprep.mubr.bf16.mxu0 %v4577_v38 }
 0x14b   :  { %4157 = vmatpush3.bf16.msra.mxu0 %v869_v45  ;;  %v4594_v45 = vld [vmem:[#allocation2 + $0xb0] sm:$0xff]  }
 0x150   :  { %4095 = vmatmul.mubr.bf16.gmra.mxu1 %v4578_v40  ;;  %4127 = vmatmul.mubr.bf16.gmra.mxu0 %v4579_v41 }
 0x151   :  { %4098 = vmatprep.mubr.bf16.mxu1 %v4580_v42  ;;  %4130 = vmatprep.mubr.bf16.mxu0 %v4581_v44 }
 0x158   :  { %4099 = vmatmul.mubr.bf16.gmra.mxu1 %v4582_v46  ;;  %4131 = vmatmul.mubr.bf16.gmra.mxu0 %v4583_v47  ;;  %v4588_v46 = vld [vmem:[#allocation2 + $0x80] sm:$0xff]  }
 0x159   :  { %4102 = vmatprep.mubr.bf16.mxu1 %v4584_v48  ;;  %4134 = vmatprep.mubr.bf16.mxu0 %v4585_v49  ;;  %v4589_v48 = vld [vmem:[#allocation2 + $0x88] sm:$0xff]   ;;  %v4590_v49 = vld [vmem:[#allocation2 + $0x90] sm:$0xff]  }
 0x160   :  { %4103 = vmatmul.mubr.bf16.gmra.mxu1 %v4586_v51  ;;  %4135 = vmatmul.mubr.bf16.gmra.mxu0 %v4587_v52  ;;  %v4591_v51 = vld [vmem:[#allocation2 + $0x98] sm:$0xff]   ;;  %v4592_v52 = vld [vmem:[#allocation2 + $0xa0] sm:$0xff]  }
 0x208   :  { %v4092_v22 = vpop.f32.mrf.mxu1  ;;  %v4124_v53 = vpop.f32.mrf.mxu0 }
 0x20a   :  { %v475_v39 = vpop.f32.mrf.mxu1  ;;  %v646_v54 = vpop.f32.mrf.mxu0 }
 0x20c   :  { %v4093_v56 = vpop.f32.mrf.mxu1  ;;  %v4125_v57 = vpop.f32.mrf.mxu0 }
 0x20d   :  { %v539_v58 = vpack.c.bf16 %v4093_v56, %v4092_v22  ;;  %v710_v3 = vpack.c.bf16 %v4125_v57, %v4124_v53  ;;  %v4595_v22 = vld [vmem:[#allocation2 + $0xb8] sm:$0xff]   ;;  %v4596_v53 = vld [vmem:[#allocation2 + $0xc0] sm:$0xff]  }
 0x20e   :  { %v478_v62 = vpop.f32.mrf.mxu1  ;;  %v649_v10 = vpop.f32.mrf.mxu0  ;;  %v4599_v56 = vld [vmem:[#allocation2 + $0xd8] sm:$0xff]   ;;  %v4600_v57 = vld [vmem:[#allocation2 + $0xe0] sm:$0xff]  }
 0x20f   :  { %v538_v60 = vpack.c.bf16 %v478_v62, %v475_v39  ;;  %v709_v61 = vpack.c.bf16 %v649_v10, %v646_v54  ;;  %v4597_v39 = vld [vmem:[#allocation2 + $0xc8] sm:$0xff]   ;;  %v4598_v54 = vld [vmem:[#allocation2 + $0xd0] sm:$0xff]  }
 0x210   :  { %v4096_v15 = vpop.f32.mrf.mxu1  ;;  %v4128_v0 = vpop.f32.mrf.mxu0  ;;  %v4601_v62 = vld [vmem:[#allocation2 + $0xe8] sm:$0xff]  }
 0x211   :  { %4140 = vmatprep.mubr.msk.bf16.mxu1 %vm209_vm1, %v709_v61  ;;  %4158 = vmatprep.mubr.msk.bf16.mxu0 %vm209_vm1, %v538_v60  ;;  %v4602_v60 = vld [vmem:[#allocation2 + $0xf0] sm:$0xff]   ;;  %v4603_v61 = vld [vmem:[#allocation2 + $0xf8] sm:$0xff]  }
 0x212   :  { %v491_v1 = vpop.f32.mrf.mxu1  ;;  %v662_v2 = vpop.f32.mrf.mxu0  ;;  %4141 = vmatmul.mubr.msk.bf16.vlgmr.msra.gmra.mxu1 %vm209_vm1, %v710_v3  ;;  %4159 = vmatmul.mubr.msk.bf16.vlgmr.msra.gmra.mxu0 %vm209_vm1, %v539_v58  ;;  %v3694_v58 = vld [vmem:[%s5761_s2 + $0x8] sm:$0xf]  ;;  %v4604_v3 = vld [vmem:[#allocation2 + $0x100] sm:$0xff]  }
 0x213   :  { %4175 = vmatpush3.bf16.msra.mxu1 %v4943_v59  ;;  %4560 = vmatprep.subr.msk.bf16.mxu0 %vm743_vm2, %v3694_v58  ;;  %v1165_v10 = vsel %vm743_vm2, %v3694_v58, 0 }
 0x214   :  { %4176 = vmatprep.subr.bf16.mxu1 %v4947_v63  ;;  %v4097_v4 = vpop.f32.mrf.mxu1  ;;  %v4129_v37 = vpop.f32.mrf.mxu0  ;;  %4207 = vmatpush3.bf16.msra.mxu0 %v1165_v10 }
 0x215   :  { %v541_v50 = vpack.c.bf16 %v4097_v4, %v4096_v15  ;;  %v712_v43 = vpack.c.bf16 %v4129_v37, %v4128_v0  ;;  %v4605_v15 = vld [vmem:[#allocation2 + $0x108] sm:$0xff]   ;;  %v4606_v0 = vld [vmem:[#allocation2 + $0x110] sm:$0xff]  }
 0x216   :  { %v494_v6 = vpop.f32.mrf.mxu1  ;;  %v665_v7 = vpop.f32.mrf.mxu0  ;;  %v5106_v4 = vld [vmem:[%s5761_s2 + $0xc] sm:$0xf] }
 0x217   :  { %v540_v8 = vpack.c.bf16 %v494_v6, %v491_v1  ;;  %v711_v9 = vpack.c.bf16 %v665_v7, %v662_v2  ;;  %4177 = vmatpush3.bf16.msra.mxu1 %v4947_v63  ;;  %v4607_v1 = vld [vmem:[#allocation2 + $0x118] sm:$0xff]   ;;  %v4608_v2 = vld [vmem:[#allocation2 + $0x120] sm:$0xff]   ;;  %4561 = vmatprep.subr.msk.bf16.mxu0 %vm743_vm2, %v5106_v4  ;;  %v4609_v37 = vld [vmem:[#allocation2 + $0x128] sm:$0xff]  }
 0x218   :  { %4178 = vmatprep.subr.bf16.mxu1 %v4961_v5  ;;  %v4100_v55 = vpop.f32.mrf.mxu1  ;;  %v4132_v12 = vpop.f32.mrf.mxu0  ;;  %v4611_v6 = vld [vmem:[#allocation2 + $0x138] sm:$0xff]   ;;  %v4612_v7 = vld [vmem:[#allocation2 + $0x140] sm:$0xff]  }
 0x219   :  { %4144 = vmatprep.mubr.msk.bf16.mxu1 %vm209_vm1, %v711_v9  ;;  %4162 = vmatprep.mubr.msk.bf16.mxu0 %vm209_vm1, %v540_v8  ;;  %v4613_v8 = vld [vmem:[#allocation2 + $0x148] sm:$0xff]   ;;  %v4614_v9 = vld [vmem:[#allocation2 + $0x150] sm:$0xff]  }
 0x21a   :  { %v507_v13 = vpop.f32.mrf.mxu1  ;;  %v678_v14 = vpop.f32.mrf.mxu0  ;;  %4145 = vmatmul.mubr.msk.bf16.gmra.mxu1 %vm209_vm1, %v712_v43  ;;  %4163 = vmatmul.mubr.msk.bf16.gmra.mxu0 %vm209_vm1, %v541_v50  ;;  %v4610_v50 = vld [vmem:[#allocation2 + $0x130] sm:$0xff]   ;;  %v4615_v43 = vld [vmem:[#allocation2 + $0x158] sm:$0xff]  }
 0x21b   :  { %4179 = vmatpush3.bf16.msra.mxu1 %v4961_v5 }
 0x21c   :  { %4180 = vmatprep.subr.bf16.mxu1 %v4973_v11  ;;  %v4101_v16 = vpop.f32.mrf.mxu1  ;;  %v4133_v27 = vpop.f32.mrf.mxu0 }
 0x21d   :  { %v543_v29 = vpack.c.bf16 %v4101_v16, %v4100_v55  ;;  %v714_v28 = vpack.c.bf16 %v4133_v27, %v4132_v12  ;;  %v4616_v55 = vld [vmem:[#allocation2 + $0x160] sm:$0xff]   ;;  %v4617_v12 = vld [vmem:[#allocation2 + $0x168] sm:$0xff]  }
 0x21e   :  { %v510_v18 = vpop.f32.mrf.mxu1  ;;  %v681_v19 = vpop.f32.mrf.mxu0  ;;  %v4620_v16 = vld [vmem:[#allocation2 + $0x180] sm:$0xff]   ;;  %v4621_v27 = vld [vmem:[#allocation2 + $0x188] sm:$0xff]  }
 0x21f   :  { %v542_v20 = vpack.c.bf16 %v510_v18, %v507_v13  ;;  %v713_v21 = vpack.c.bf16 %v681_v19, %v678_v14  ;;  %4181 = vmatpush3.bf16.msra.mxu1 %v4973_v11  ;;  %v4618_v13 = vld [vmem:[#allocation2 + $0x170] sm:$0xff]   ;;  %v4619_v14 = vld [vmem:[#allocation2 + $0x178] sm:$0xff]   ;;  %v4624_v19 = vld [vmem:[#allocation2 + $0x1a0] sm:$0xff]  }
 0x220   :  { %4182 = vmatprep.subr.bf16.mxu1 %v4985_v17  ;;  %v4104_v31 = vpop.f32.mrf.mxu1  ;;  %v4136_v26 = vpop.f32.mrf.mxu0  ;;  %v4623_v18 = vld [vmem:[#allocation2 + $0x198] sm:$0xff]  }
 0x221   :  { %4148 = vmatprep.mubr.msk.bf16.mxu1 %vm209_vm1, %v713_v21  ;;  %4166 = vmatprep.mubr.msk.bf16.mxu0 %vm209_vm1, %v542_v20  ;;  %v4625_v20 = vld [vmem:[#allocation2 + $0x1a8] sm:$0xff]   ;;  %v4626_v21 = vld [vmem:[#allocation2 + $0x1b0] sm:$0xff]  }
 0x222   :  { %v523_v32 = vpop.f32.mrf.mxu1  ;;  %v694_v33 = vpop.f32.mrf.mxu0  ;;  %4149 = vmatmul.mubr.msk.bf16.gmra.mxu1 %vm209_vm1, %v714_v28  ;;  %4167 = vmatmul.mubr.msk.bf16.gmra.mxu0 %vm209_vm1, %v543_v29  ;;  %v4622_v29 = vld [vmem:[#allocation2 + $0x190] sm:$0xff]   ;;  %v4627_v28 = vld [vmem:[#allocation2 + $0x1b8] sm:$0xff]  }
 0x223   :  { %4183 = vmatpush3.bf16.msra.mxu1 %v4985_v17 }
 0x224   :  { %4184 = vmatprep.subr.bf16.mxu1 %v4997_v23  ;;  %v4105_v34 = vpop.f32.mrf.mxu1  ;;  %v4137_v36 = vpop.f32.mrf.mxu0 }
 0x225   :  { %v545_v38 = vpack.c.bf16 %v4105_v34, %v4104_v31  ;;  %v716_v47 = vpack.c.bf16 %v4137_v36, %v4136_v26  ;;  %v4628_v31 = vld [vmem:[#allocation2 + $0x1c0] sm:$0xff]   ;;  %v4629_v26 = vld [vmem:[#allocation2 + $0x1c8] sm:$0xff]  }
 0x226   :  { %v526_v40 = vpop.f32.mrf.mxu1  ;;  %v697_v41 = vpop.f32.mrf.mxu0 }
 0x227   :  { %v544_v42 = vpack.c.bf16 %v526_v40, %v523_v32  ;;  %v715_v44 = vpack.c.bf16 %v697_v41, %v694_v33  ;;  %4185 = vmatpush3.bf16.msra.mxu1 %v4997_v23  ;;  %v4630_v32 = vld [vmem:[#allocation2 + $0x1d0] sm:$0xff]  }
 0x228   :  { %4186 = vmatprep.subr.bf16.mxu1 %v5003_v24 }
 0x229   :  { %4152 = vmatprep.mubr.msk.bf16.mxu1 %vm209_vm1, %v715_v44  ;;  %4170 = vmatprep.mubr.msk.bf16.mxu0 %vm209_vm1, %v544_v42 }
 0x22a   :  { %4153 = vmatmul.mubr.msk.bf16.gmra.mxu1 %vm209_vm1, %v716_v47  ;;  %4171 = vmatmul.mubr.msk.bf16.gmra.mxu0 %vm209_vm1, %v545_v38 }
 0x22b   :  { %4187 = vmatpush3.bf16.msra.mxu1 %v5003_v24  ;;  %4190 = vmatprep.mubr.bf16.mxu1 %v4588_v46  ;;  %v4631_v46 = vld [vmem:[#allocation2 + $0x1d8] sm:$0xff]  }
 0x22c   :  { %4188 = vmatprep.subr.bf16.mxu1 %v5009_v25 }
 0x22f   :  { %4189 = vmatpush3.bf16.msra.mxu1 %v5009_v25 }
 0x230   :  { %4224 = vmatprep.subr.bf16.mxu1 %v4943_v59 }
 0x232   :  { %4191 = vmatmul.mubr.bf16.vlgmr.msra.gmra.mxu1 %v4589_v48  ;;  %v4632_v48 = vld [vmem:[#allocation2 + $0x1e0] sm:$0xff]  }
 0x233   :  { %4225 = vmatpush3.bf16.msra.mxu1 %v4943_v59  ;;  %4194 = vmatprep.mubr.bf16.mxu1 %v4590_v49 }
 0x234   :  { %4226 = vmatprep.subr.bf16.mxu1 %v4947_v63 }
 0x237   :  { %4227 = vmatpush3.bf16.msra.mxu1 %v4947_v63 }
 0x238   :  { %4228 = vmatprep.subr.bf16.mxu1 %v4961_v5 }
 0x23a   :  { %4195 = vmatmul.mubr.bf16.gmra.mxu1 %v4591_v51 }
 0x23b   :  { %4229 = vmatpush3.bf16.msra.mxu1 %v4961_v5  ;;  %4198 = vmatprep.mubr.bf16.mxu1 %v4592_v52 }
 0x23c   :  { %4230 = vmatprep.subr.bf16.mxu1 %v4973_v11 }
 0x23f   :  { %4231 = vmatpush3.bf16.msra.mxu1 %v4973_v11 }
 0x240   :  { %4232 = vmatprep.subr.bf16.mxu1 %v4985_v17 }
 0x242   :  { %4199 = vmatmul.mubr.bf16.gmra.mxu1 %v4593_v30 }
 0x243   :  { %4233 = vmatpush3.bf16.msra.mxu1 %v4985_v17  ;;  %4202 = vmatprep.mubr.bf16.mxu1 %v4594_v45 }
 0x244   :  { %4234 = vmatprep.subr.bf16.mxu1 %v4997_v23 }
 0x247   :  { %4235 = vmatpush3.bf16.msra.mxu1 %v4997_v23 }
 0x248   :  { %4236 = vmatprep.subr.bf16.mxu1 %v5003_v24 }
 0x24a   :  { %4203 = vmatmul.mubr.bf16.gmra.mxu1 %v4595_v22 }
 0x24b   :  { %4237 = vmatpush3.bf16.msra.mxu1 %v5003_v24  ;;  %4240 = vmatprep.mubr.bf16.mxu1 %v4596_v53 }
 0x24c   :  { %4238 = vmatprep.subr.bf16.mxu1 %v5009_v25 }
 0x24f   :  { %4239 = vmatpush3.bf16.msra.mxu1 %v5009_v25 }
 0x250   :  { %4274 = vmatprep.subr.bf16.mxu1 %v4943_v59 }
 0x252   :  { %4241 = vmatmul.mubr.bf16.vlgmr.msra.gmra.mxu1 %v4597_v39 }
 0x253   :  { %4275 = vmatpush3.bf16.msra.mxu1 %v4943_v59  ;;  %4244 = vmatprep.mubr.bf16.mxu1 %v4598_v54 }
 0x254   :  { %4276 = vmatprep.subr.bf16.mxu1 %v4947_v63 }
 0x257   :  { %4277 = vmatpush3.bf16.msra.mxu1 %v4947_v63 }
 0x258   :  { %4278 = vmatprep.subr.bf16.mxu1 %v4961_v5 }
 0x25a   :  { %4245 = vmatmul.mubr.bf16.gmra.mxu1 %v4599_v56 }
 0x25b   :  { %4279 = vmatpush3.bf16.msra.mxu1 %v4961_v5  ;;  %4248 = vmatprep.mubr.bf16.mxu1 %v4600_v57  ;;  %v4633_v57 = vld [vmem:[#allocation2 + $0x1e8] sm:$0xff]  }
 0x25c   :  { %4280 = vmatprep.subr.bf16.mxu1 %v4973_v11 }
 0x25f   :  { %4281 = vmatpush3.bf16.msra.mxu1 %v4973_v11 }
 0x260   :  { %4282 = vmatprep.subr.bf16.mxu1 %v4985_v17 }
 0x262   :  { %4249 = vmatmul.mubr.bf16.gmra.mxu1 %v4601_v62  ;;  %v4634_v62 = vld [vmem:[#allocation2 + $0x1f0] sm:$0xff]  }
 0x263   :  { %4283 = vmatpush3.bf16.msra.mxu1 %v4985_v17  ;;  %4252 = vmatprep.mubr.bf16.mxu1 %v4602_v60 }
 0x264   :  { %4284 = vmatprep.subr.bf16.mxu1 %v4997_v23 }
 0x267   :  { %4285 = vmatpush3.bf16.msra.mxu1 %v4997_v23 }
 0x268   :  { %4286 = vmatprep.subr.bf16.mxu1 %v5003_v24 }
 0x26a   :  { %4253 = vmatmul.mubr.bf16.gmra.mxu1 %v4603_v61 }
 0x26b   :  { %4287 = vmatpush3.bf16.msra.mxu1 %v5003_v24  ;;  %4290 = vmatprep.mubr.bf16.mxu1 %v4604_v3 }
 0x26c   :  { %4288 = vmatprep.subr.bf16.mxu1 %v5009_v25 }
 0x26f   :  { %4289 = vmatpush3.bf16.msra.mxu1 %v5009_v25 }
 0x270   :  { %4324 = vmatprep.subr.bf16.mxu1 %v4943_v59 }
 0x272   :  { %4291 = vmatmul.mubr.bf16.vlgmr.msra.gmra.mxu1 %v4605_v15 }
 0x273   :  { %4325 = vmatpush3.bf16.msra.mxu1 %v4943_v59  ;;  %4294 = vmatprep.mubr.bf16.mxu1 %v4606_v0 }
 0x274   :  { %4326 = vmatprep.subr.bf16.mxu1 %v4947_v63 }
 0x277   :  { %4327 = vmatpush3.bf16.msra.mxu1 %v4947_v63 }
 0x278   :  { %4328 = vmatprep.subr.bf16.mxu1 %v4961_v5 }
 0x27a   :  { %4295 = vmatmul.mubr.bf16.gmra.mxu1 %v4607_v1 }
 0x27b   :  { %4329 = vmatpush3.bf16.msra.mxu1 %v4961_v5  ;;  %4298 = vmatprep.mubr.bf16.mxu1 %v4608_v2 }
 0x27c   :  { %4330 = vmatprep.subr.bf16.mxu1 %v4973_v11 }
 0x27f   :  { %4331 = vmatpush3.bf16.msra.mxu1 %v4973_v11 }
 0x280   :  { %4332 = vmatprep.subr.bf16.mxu1 %v4985_v17 }
 0x282   :  { %4299 = vmatmul.mubr.bf16.gmra.mxu1 %v4609_v37 }
 0x283   :  { %4333 = vmatpush3.bf16.msra.mxu1 %v4985_v17  ;;  %4302 = vmatprep.mubr.bf16.mxu1 %v4610_v50 }
 0x284   :  { %4334 = vmatprep.subr.bf16.mxu1 %v4997_v23 }
 0x287   :  { %4335 = vmatpush3.bf16.msra.mxu1 %v4997_v23 }
 0x288   :  { %4336 = vmatprep.subr.bf16.mxu1 %v5003_v24 }
 0x28a   :  { %4303 = vmatmul.mubr.bf16.gmra.mxu1 %v4611_v6  ;;  %v4635_v6 = vld [vmem:[#allocation2 + $0x1f8] sm:$0xff]  }
 0x28b   :  { %4337 = vmatpush3.bf16.msra.mxu1 %v5003_v24  ;;  %4340 = vmatprep.mubr.bf16.mxu1 %v4612_v7 }
 0x28c   :  { %4338 = vmatprep.subr.bf16.mxu1 %v5009_v25 }
 0x28f   :  { %4339 = vmatpush3.bf16.msra.mxu1 %v5009_v25 }
 0x290   :  { %4374 = vmatprep.subr.bf16.mxu1 %v4943_v59 }
 0x292   :  { %4341 = vmatmul.mubr.bf16.vlgmr.msra.gmra.mxu1 %v4613_v8 }
 0x293   :  { %4375 = vmatpush3.bf16.msra.mxu1 %v4943_v59  ;;  %4344 = vmatprep.mubr.bf16.mxu1 %v4614_v9 }
 0x294   :  { %4376 = vmatprep.subr.bf16.mxu1 %v4947_v63 }
 0x297   :  { %4377 = vmatpush3.bf16.msra.mxu1 %v4947_v63 }
 0x298   :  { %4378 = vmatprep.subr.bf16.mxu1 %v4961_v5 }
 0x29a   :  { %4345 = vmatmul.mubr.bf16.gmra.mxu1 %v4615_v43 }
 0x29b   :  { %4379 = vmatpush3.bf16.msra.mxu1 %v4961_v5  ;;  %4348 = vmatprep.mubr.bf16.mxu1 %v4616_v55 }
 0x29c   :  { %4380 = vmatprep.subr.bf16.mxu1 %v4973_v11 }
 0x29f   :  { %4381 = vmatpush3.bf16.msra.mxu1 %v4973_v11 }
 0x2a0   :  { %4382 = vmatprep.subr.bf16.mxu1 %v4985_v17 }
 0x2a2   :  { %4349 = vmatmul.mubr.bf16.gmra.mxu1 %v4617_v12 }
 0x2a3   :  { %4383 = vmatpush3.bf16.msra.mxu1 %v4985_v17  ;;  %4352 = vmatprep.mubr.bf16.mxu1 %v4618_v13 }
 0x2a4   :  { %4384 = vmatprep.subr.bf16.mxu1 %v4997_v23 }
 0x2a7   :  { %4385 = vmatpush3.bf16.msra.mxu1 %v4997_v23 }
 0x2a8   :  { %4386 = vmatprep.subr.bf16.mxu1 %v5003_v24 }
 0x2aa   :  { %4353 = vmatmul.mubr.bf16.gmra.mxu1 %v4619_v14 }
 0x2ab   :  { %4387 = vmatpush3.bf16.msra.mxu1 %v5003_v24  ;;  %4390 = vmatprep.mubr.bf16.mxu1 %v4620_v16 }
 0x2ac   :  { %4388 = vmatprep.subr.bf16.mxu1 %v5009_v25 }
 0x2af   :  { %4389 = vmatpush3.bf16.msra.mxu1 %v5009_v25 }
 0x2b0   :  { %4424 = vmatprep.subr.bf16.mxu1 %v4943_v59 }
 0x2b2   :  { %4391 = vmatmul.mubr.bf16.vlgmr.msra.gmra.mxu1 %v4621_v27 }
 0x2b3   :  { %4425 = vmatpush3.bf16.msra.mxu1 %v4943_v59  ;;  %4394 = vmatprep.mubr.bf16.mxu1 %v4622_v29 }
 0x2b4   :  { %4426 = vmatprep.subr.bf16.mxu1 %v4947_v63 }
 0x2b7   :  { %4427 = vmatpush3.bf16.msra.mxu1 %v4947_v63 }
 0x2b8   :  { %4428 = vmatprep.subr.bf16.mxu1 %v4961_v5 }
 0x2ba   :  { %4395 = vmatmul.mubr.bf16.gmra.mxu1 %v4623_v18 }
 0x2bb   :  { %4429 = vmatpush3.bf16.msra.mxu1 %v4961_v5  ;;  %4398 = vmatprep.mubr.bf16.mxu1 %v4624_v19 }
 0x2bc   :  { %4430 = vmatprep.subr.bf16.mxu1 %v4973_v11 }
 0x2bf   :  { %4431 = vmatpush3.bf16.msra.mxu1 %v4973_v11 }
 0x2c0   :  { %4432 = vmatprep.subr.bf16.mxu1 %v4985_v17 }
 0x2c2   :  { %4399 = vmatmul.mubr.bf16.gmra.mxu1 %v4625_v20 }
 0x2c3   :  { %4433 = vmatpush3.bf16.msra.mxu1 %v4985_v17  ;;  %4402 = vmatprep.mubr.bf16.mxu1 %v4626_v21 }
 0x2c4   :  { %4434 = vmatprep.subr.bf16.mxu1 %v4997_v23 }
 0x2c7   :  { %4435 = vmatpush3.bf16.msra.mxu1 %v4997_v23 }
 0x2c8   :  { %4436 = vmatprep.subr.bf16.mxu1 %v5003_v24 }
 0x2ca   :  { %4403 = vmatmul.mubr.bf16.gmra.mxu1 %v4627_v28 }
 0x2cb   :  { %4437 = vmatpush3.bf16.msra.mxu1 %v5003_v24  ;;  %4440 = vmatprep.mubr.bf16.mxu1 %v4628_v31 }
 0x2cc   :  { %4438 = vmatprep.subr.bf16.mxu1 %v5009_v25 }
 0x2cf   :  { %4439 = vmatpush3.bf16.msra.mxu1 %v5009_v25 }
 0x2d0   :  { %4542 = vmatprep.subr.bf16.mxu1 %v4943_v59 }
 0x2d2   :  { %v4142_v33 = vpop.f32.mrf.mxu1  ;;  %v4160_v34 = vpop.f32.mrf.mxu0  ;;  %4441 = vmatmul.mubr.bf16.vlgmr.msra.gmra.mxu1 %v4629_v26 }
 0x2d3   :  { %v5152_v36 = vadd.f32 %v4160_v34, %v4142_v33  ;;  %4550 = vmatpush3.bf16.msra.mxu1 %v4943_v59  ;;  %4444 = vmatprep.mubr.bf16.mxu1 %v4630_v32  ;;  %v1477_v34 = vsel %vm743_vm2, %v5106_v4, 0 }
 0x2d4   :  { %4543 = vmatprep.subr.bf16.mxu1 %v4947_v63  ;;  %v781_v38 = vpop.f32.mrf.mxu1  ;;  %v905_v40 = vpop.f32.mrf.mxu0 }
 0x2d5   :  { %v5156_v41 = vadd.f32 %v905_v40, %v781_v38  ;;  %v3728_v38 = vld [vmem:[%s5761_s2 + $0x10] sm:$0xf] }
 0x2d6   :  { %v4143_v42 = vpop.f32.mrf.mxu1  ;;  %v4161_v44 = vpop.f32.mrf.mxu0 }
 0x2d7   :  { %v5158_v47 = vadd.f32 %v4161_v44, %v4143_v42  ;;  %4551 = vmatpush3.bf16.msra.mxu1 %v4947_v63 }
 0x2d8   :  { %4544 = vmatprep.subr.bf16.mxu1 %v4961_v5  ;;  %v5162_v49 = vpop.f32.mrf.mxu1  ;;  %v5164_v51 = vpop.f32.mrf.mxu0 }
 0x2da   :  { %v4146_v52 = vpop.f32.mrf.mxu1  ;;  %v4164_v30 = vpop.f32.mrf.mxu0  ;;  %4445 = vmatmul.mubr.bf16.gmra.mxu1 %v4631_v46 }
 0x2db   :  { %v5166_v45 = vadd.f32 %v4164_v30, %v4146_v52  ;;  %4552 = vmatpush3.bf16.msra.mxu1 %v4961_v5  ;;  %4448 = vmatprep.mubr.bf16.mxu1 %v4632_v48 }
 0x2dc   :  { %4545 = vmatprep.subr.bf16.mxu1 %v4973_v11  ;;  %v797_v22 = vpop.f32.mrf.mxu1  ;;  %v921_v53 = vpop.f32.mrf.mxu0 }
 0x2dd   :  { %v5170_v39 = vadd.f32 %v921_v53, %v797_v22 }
 0x2de   :  { %v4147_v54 = vpop.f32.mrf.mxu1  ;;  %v4165_v56 = vpop.f32.mrf.mxu0 }
 0x2df   :  { %v5172_v58 = vadd.f32 %v4165_v56, %v4147_v54  ;;  %4553 = vmatpush3.bf16.msra.mxu1 %v4973_v11 }
 0x2e0   :  { %4546 = vmatprep.subr.bf16.mxu1 %v4985_v17  ;;  %v5176_v10 = vpop.f32.mrf.mxu1  ;;  %v5178_v60 = vpop.f32.mrf.mxu0 }
 0x2e2   :  { %v4150_v61 = vpop.f32.mrf.mxu1  ;;  %v4168_v3 = vpop.f32.mrf.mxu0  ;;  %4449 = vmatmul.mubr.bf16.gmra.mxu1 %v4633_v57 }
 0x2e3   :  { %v5180_v15 = vadd.f32 %v4168_v3, %v4150_v61  ;;  %4554 = vmatpush3.bf16.msra.mxu1 %v4985_v17  ;;  %4452 = vmatprep.mubr.bf16.mxu1 %v4634_v62 }
 0x2e4   :  { %4547 = vmatprep.subr.bf16.mxu1 %v4997_v23  ;;  %v813_v0 = vpop.f32.mrf.mxu1  ;;  %v937_v1 = vpop.f32.mrf.mxu0 }
 0x2e5   :  { %v5184_v2 = vadd.f32 %v937_v1, %v813_v0 }
 0x2e6   :  { %v4151_v37 = vpop.f32.mrf.mxu1  ;;  %v4169_v50 = vpop.f32.mrf.mxu0 }
 0x2e7   :  { %v5186_v7 = vadd.f32 %v4169_v50, %v4151_v37  ;;  %4555 = vmatpush3.bf16.msra.mxu1 %v4997_v23 }
 0x2e8   :  { %4548 = vmatprep.subr.bf16.mxu1 %v5003_v24  ;;  %v5190_v8 = vpop.f32.mrf.mxu1  ;;  %v5192_v9 = vpop.f32.mrf.mxu0 }
 0x2ea   :  { %v4154_v43 = vpop.f32.mrf.mxu1  ;;  %v4172_v55 = vpop.f32.mrf.mxu0  ;;  %4453 = vmatmul.mubr.bf16.gmra.mxu1 %v4635_v6 }
 0x2eb   :  { %v5194_v12 = vadd.f32 %v4172_v55, %v4154_v43  ;;  %4556 = vmatpush3.bf16.msra.mxu1 %v5003_v24 }
 0x2ec   :  { %4549 = vmatprep.subr.bf16.mxu1 %v5009_v25  ;;  %v829_v13 = vpop.f32.mrf.mxu1  ;;  %v953_v14 = vpop.f32.mrf.mxu0 }
 0x2ed   :  { %v5198_v16 = vadd.f32 %v953_v14, %v829_v13  ;;  %v1789_v14 = vsel %vm743_vm2, %v3728_v38, 0 }
 0x2ee   :  { %v4155_v27 = vpop.f32.mrf.mxu1  ;;  %v4173_v29 = vpop.f32.mrf.mxu0 }
 0x2ef   :  { %v5200_v18 = vadd.f32 %v4173_v29, %v4155_v27  ;;  %4557 = vmatpush3.bf16.msra.mxu1 %v5009_v25  ;;  %v3745_v27 = vld [vmem:[%s5761_s2 + $0x14] sm:$0xf] }
 0x2f0   :  { %v5203_v19 = vpop.f32.mrf.mxu1 }
 0x2f2   :  { %v4192_v20 = vpop.f32.mrf.mxu1 }
 0x2f4   :  { %v1067_v21 = vpop.f32.mrf.mxu1 }
 0x2f6   :  { %v4193_v28 = vpop.f32.mrf.mxu1 }
 0x2f7   :  { %v1131_v32 = vpack.c.bf16 %v4193_v28, %v4192_v20 }
 0x2f8   :  { %v1070_v31 = vpop.f32.mrf.mxu1 }
 0x2f9   :  { %v1130_v26 = vpack.c.bf16 %v1070_v31, %v1067_v21 }
 0x2fa   :  { %v4196_v33 = vpop.f32.mrf.mxu1 }
 0x2fb   :  { %4208 = vmatprep.mubr.msk.bf16.mxu0 %vm209_vm1, %v1130_v26 }
 0x2fc   :  { %v1083_v40 = vpop.f32.mrf.mxu1  ;;  %4209 = vmatmul.mubr.msk.bf16.vlgmr.msra.gmra.mxu0 %vm209_vm1, %v1131_v32 }
 0x2fd   :  { %4257 = vmatpush3.bf16.msra.mxu0 %v1477_v34 }
 0x2fe   :  { %v4197_v42 = vpop.f32.mrf.mxu1  ;;  %4562 = vmatprep.subr.msk.bf16.mxu0 %vm743_vm2, %v3728_v38 }
 0x2ff   :  { %v1133_v48 = vpack.c.bf16 %v4197_v42, %v4196_v33 }
 0x300   :  { %v1086_v44 = vpop.f32.mrf.mxu1 }
 0x301   :  { %v1132_v46 = vpack.c.bf16 %v1086_v44, %v1083_v40 }
 0x302   :  { %v4200_v52 = vpop.f32.mrf.mxu1 }
 0x303   :  { %4212 = vmatprep.mubr.msk.bf16.mxu0 %vm209_vm1, %v1132_v46 }
 0x304   :  { %v1099_v4 = vpop.f32.mrf.mxu1  ;;  %4213 = vmatmul.mubr.msk.bf16.gmra.mxu0 %vm209_vm1, %v1133_v48 }
 0x306   :  { %v4201_v30 = vpop.f32.mrf.mxu1 }
 0x307   :  { %v1135_v54 = vpack.c.bf16 %v4201_v30, %v4200_v52 }
 0x308   :  { %v1102_v22 = vpop.f32.mrf.mxu1 }
 0x309   :  { %v1134_v53 = vpack.c.bf16 %v1102_v22, %v1099_v4 }
 0x30a   :  { %v4204_v56 = vpop.f32.mrf.mxu1 }
 0x30b   :  { %4216 = vmatprep.mubr.msk.bf16.mxu0 %vm209_vm1, %v1134_v53 }
 0x30c   :  { %v1115_v57 = vpop.f32.mrf.mxu1  ;;  %4217 = vmatmul.mubr.msk.bf16.gmra.mxu0 %vm209_vm1, %v1135_v54 }
 0x30e   :  { %v4205_v62 = vpop.f32.mrf.mxu1 }
 0x30f   :  { %v1137_v0 = vpack.c.bf16 %v4205_v62, %v4204_v56 }
 0x310   :  { %v1118_v61 = vpop.f32.mrf.mxu1 }
 0x311   :  { %v1136_v3 = vpack.c.bf16 %v1118_v61, %v1115_v57  ;;  %v2101_v61 = vsel %vm743_vm2, %v3745_v27, 0 }
 0x312   :  { %v4242_v1 = vpop.f32.mrf.mxu1 }
 0x313   :  { %4220 = vmatprep.mubr.msk.bf16.mxu0 %vm209_vm1, %v1136_v3  ;;  %v3762_v3 = vld [vmem:[%s5761_s2 + $0x18] sm:$0xf] }
 0x314   :  { %4221 = vmatmul.mubr.msk.bf16.gmra.mxu0 %vm209_vm1, %v1137_v0  ;;  %v1379_v37 = vpop.f32.mrf.mxu1 }
 0x316   :  { %v4243_v50 = vpop.f32.mrf.mxu1 }
 0x317   :  { %v1443_v55 = vpack.c.bf16 %v4243_v50, %v4242_v1  ;;  %v4638_v1 = vld [vmem:[#allocation2 + $0x210] sm:$0xff]  }
 0x318   :  { %v1382_v6 = vpop.f32.mrf.mxu1  ;;  %4494 = vmatprep.mubr.bf16.mxu1 %v4638_v1 }
 0x319   :  { %v1442_v43 = vpack.c.bf16 %v1382_v6, %v1379_v37  ;;  %v4639_v37 = vld [vmem:[#allocation2 + $0x218] sm:$0xff]  }
 0x31a   :  { %v4246_v13 = vpop.f32.mrf.mxu1  ;;  %4495 = vmatmul.mubr.bf16.vlgmr.msra.gmra.mxu1 %v4639_v37 }
 0x31b   :  { %4258 = vmatprep.mubr.msk.bf16.mxu0 %vm209_vm1, %v1442_v43 }
 0x31c   :  { %v1395_v29 = vpop.f32.mrf.mxu1  ;;  %4259 = vmatmul.mubr.msk.bf16.vlgmr.msra.gmra.mxu0 %vm209_vm1, %v1443_v55 }
 0x31d   :  { %4307 = vmatpush3.bf16.msra.mxu0 %v1789_v14 }
 0x31e   :  { %v4247_v20 = vpop.f32.mrf.mxu1  ;;  %4563 = vmatprep.subr.msk.bf16.mxu0 %vm743_vm2, %v3745_v27  ;;  %v4640_v27 = vld [vmem:[#allocation2 + $0x220] sm:$0xff]  }
 0x31f   :  { %v1445_v31 = vpack.c.bf16 %v4247_v20, %v4246_v13  ;;  %4498 = vmatprep.mubr.bf16.mxu1 %v4640_v27 }
 0x320   :  { %v1398_v21 = vpop.f32.mrf.mxu1 }
 0x321   :  { %v1444_v28 = vpack.c.bf16 %v1398_v21, %v1395_v29  ;;  %v4641_v29 = vld [vmem:[#allocation2 + $0x228] sm:$0xff]  }
 0x322   :  { %v4250_v26 = vpop.f32.mrf.mxu1  ;;  %4499 = vmatmul.mubr.bf16.gmra.mxu1 %v4641_v29 }
 0x323   :  { %4262 = vmatprep.mubr.msk.bf16.mxu0 %vm209_vm1, %v1444_v28 }
 0x324   :  { %v1411_v32 = vpop.f32.mrf.mxu1  ;;  %4263 = vmatmul.mubr.msk.bf16.gmra.mxu0 %vm209_vm1, %v1445_v31 }
 0x326   :  { %v4251_v33 = vpop.f32.mrf.mxu1 }
 0x327   :  { %v1447_v40 = vpack.c.bf16 %v4251_v33, %v4250_v26  ;;  %v4642_v33 = vld [vmem:[#allocation2 + $0x230] sm:$0xff]  }
 0x328   :  { %v1414_v34 = vpop.f32.mrf.mxu1  ;;  %4502 = vmatprep.mubr.bf16.mxu1 %v4642_v33 }
 0x329   :  { %v1446_v38 = vpack.c.bf16 %v1414_v34, %v1411_v32  ;;  %v4643_v34 = vld [vmem:[#allocation2 + $0x238] sm:$0xff]  }
 0x32a   :  { %v4254_v42 = vpop.f32.mrf.mxu1  ;;  %4503 = vmatmul.mubr.bf16.gmra.mxu1 %v4643_v34 }
 0x32b   :  { %4266 = vmatprep.mubr.msk.bf16.mxu0 %vm209_vm1, %v1446_v38 }
 0x32c   :  { %v1427_v44 = vpop.f32.mrf.mxu1  ;;  %4267 = vmatmul.mubr.msk.bf16.gmra.mxu0 %vm209_vm1, %v1447_v40 }
 0x32e   :  { %v4255_v46 = vpop.f32.mrf.mxu1 }
 0x32f   :  { %v1449_v4 = vpack.c.bf16 %v4255_v46, %v4254_v42 }
 0x330   :  { %v1430_v48 = vpop.f32.mrf.mxu1 }
 0x331   :  { %v1448_v52 = vpack.c.bf16 %v1430_v48, %v1427_v44 }
 0x332   :  { %v4292_v30 = vpop.f32.mrf.mxu1 }
 0x333   :  { %4270 = vmatprep.mubr.msk.bf16.mxu0 %vm209_vm1, %v1448_v52 }
 0x334   :  { %4271 = vmatmul.mubr.msk.bf16.gmra.mxu0 %vm209_vm1, %v1449_v4  ;;  %v1691_v22 = vpop.f32.mrf.mxu1 }
 0x336   :  { %v4293_v53 = vpop.f32.mrf.mxu1 }
 0x337   :  { %v1755_v57 = vpack.c.bf16 %v4293_v53, %v4292_v30 }
 0x338   :  { %v1694_v54 = vpop.f32.mrf.mxu1 }
 0x339   :  { %v1754_v56 = vpack.c.bf16 %v1694_v54, %v1691_v22  ;;  %v2413_v54 = vsel %vm743_vm2, %v3762_v3, 0 }
 0x33a   :  { %v4296_v62 = vpop.f32.mrf.mxu1 }
 0x33b   :  { %4308 = vmatprep.mubr.msk.bf16.mxu0 %vm209_vm1, %v1754_v56  ;;  %v3779_v56 = vld [vmem:[%s5761_s2 + $0x1c] sm:$0xf] }
 0x33c   :  { %v1707_v0 = vpop.f32.mrf.mxu1  ;;  %4309 = vmatmul.mubr.msk.bf16.vlgmr.msra.gmra.mxu0 %vm209_vm1, %v1755_v57 }
 0x33d   :  { %4357 = vmatpush3.bf16.msra.mxu0 %v2101_v61 }
 0x33e   :  { %v4297_v50 = vpop.f32.mrf.mxu1  ;;  %4564 = vmatprep.subr.msk.bf16.mxu0 %vm743_vm2, %v3762_v3 }
 0x33f   :  { %v1757_v55 = vpack.c.bf16 %v4297_v50, %v4296_v62 }
 0x340   :  { %v1710_v6 = vpop.f32.mrf.mxu1 }
 0x341   :  { %v1756_v43 = vpack.c.bf16 %v1710_v6, %v1707_v0 }
 0x342   :  { %v4300_v13 = vpop.f32.mrf.mxu1 }
 0x343   :  { %4312 = vmatprep.mubr.msk.bf16.mxu0 %vm209_vm1, %v1756_v43 }
 0x344   :  { %v1723_v14 = vpop.f32.mrf.mxu1  ;;  %4313 = vmatmul.mubr.msk.bf16.gmra.mxu0 %vm209_vm1, %v1757_v55 }
 0x346   :  { %v4301_v20 = vpop.f32.mrf.mxu1 }
 0x347   :  { %v1759_v31 = vpack.c.bf16 %v4301_v20, %v4300_v13 }
 0x348   :  { %v1726_v21 = vpop.f32.mrf.mxu1 }
 0x349   :  { %v1758_v28 = vpack.c.bf16 %v1726_v21, %v1723_v14 }
 0x34a   :  { %v4304_v26 = vpop.f32.mrf.mxu1 }
 0x34b   :  { %4316 = vmatprep.mubr.msk.bf16.mxu0 %vm209_vm1, %v1758_v28 }
 0x34c   :  { %v1739_v32 = vpop.f32.mrf.mxu1  ;;  %4317 = vmatmul.mubr.msk.bf16.gmra.mxu0 %vm209_vm1, %v1759_v31 }
 0x34e   :  { %v4305_v38 = vpop.f32.mrf.mxu1 }
 0x34f   :  { %v1761_v44 = vpack.c.bf16 %v4305_v38, %v4304_v26 }
 0x350   :  { %v1742_v40 = vpop.f32.mrf.mxu1 }
 0x351   :  { %v1760_v42 = vpack.c.bf16 %v1742_v40, %v1739_v32  ;;  %v2725_v40 = vsel %vm743_vm2, %v3779_v56, 0 }
 0x352   :  { %v4342_v46 = vpop.f32.mrf.mxu1 }
 0x353   :  { %4320 = vmatprep.mubr.msk.bf16.mxu0 %vm209_vm1, %v1760_v42 }
 0x354   :  { %4321 = vmatmul.mubr.msk.bf16.gmra.mxu0 %vm209_vm1, %v1761_v44  ;;  %v2003_v48 = vpop.f32.mrf.mxu1 }
 0x356   :  { %v4343_v52 = vpop.f32.mrf.mxu1 }
 0x357   :  { %v2067_v22 = vpack.c.bf16 %v4343_v52, %v4342_v46 }
 0x358   :  { %v2006_v4 = vpop.f32.mrf.mxu1 }
 0x359   :  { %v2066_v30 = vpack.c.bf16 %v2006_v4, %v2003_v48 }
 0x35a   :  { %v4346_v53 = vpop.f32.mrf.mxu1 }
 0x35b   :  { %4358 = vmatprep.mubr.msk.bf16.mxu0 %vm209_vm1, %v2066_v30 }
 0x35c   :  { %v2019_v57 = vpop.f32.mrf.mxu1  ;;  %4359 = vmatmul.mubr.msk.bf16.vlgmr.msra.gmra.mxu0 %vm209_vm1, %v2067_v22 }
 0x35d   :  { %4407 = vmatpush3.bf16.msra.mxu0 %v2413_v54 }
 0x35e   :  { %v4347_v62 = vpop.f32.mrf.mxu1  ;;  %4565 = vmatprep.subr.msk.bf16.mxu0 %vm743_vm2, %v3779_v56 }
 0x35f   :  { %v2069_v1 = vpack.c.bf16 %v4347_v62, %v4346_v53 }
 0x360   :  { %v2022_v61 = vpop.f32.mrf.mxu1 }
 0x361   :  { %v2068_v0 = vpack.c.bf16 %v2022_v61, %v2019_v57 }
 0x362   :  { %v4350_v37 = vpop.f32.mrf.mxu1 }
 0x363   :  { %4362 = vmatprep.mubr.msk.bf16.mxu0 %vm209_vm1, %v2068_v0 }
 0x364   :  { %v2035_v3 = vpop.f32.mrf.mxu1  ;;  %4363 = vmatmul.mubr.msk.bf16.gmra.mxu0 %vm209_vm1, %v2069_v1 }
 0x366   :  { %v4351_v50 = vpop.f32.mrf.mxu1 }
 0x367   :  { %v2071_v55 = vpack.c.bf16 %v4351_v50, %v4350_v37 }
 0x368   :  { %v2038_v6 = vpop.f32.mrf.mxu1 }
 0x369   :  { %v2070_v43 = vpack.c.bf16 %v2038_v6, %v2035_v3 }
 0x36a   :  { %v4354_v13 = vpop.f32.mrf.mxu1 }
 0x36b   :  { %4366 = vmatprep.mubr.msk.bf16.mxu0 %vm209_vm1, %v2070_v43 }
 0x36c   :  { %v2051_v14 = vpop.f32.mrf.mxu1  ;;  %4367 = vmatmul.mubr.msk.bf16.gmra.mxu0 %vm209_vm1, %v2071_v55 }
 0x36e   :  { %v4355_v27 = vpop.f32.mrf.mxu1 }
 0x36f   :  { %v2073_v21 = vpack.c.bf16 %v4355_v27, %v4354_v13 }
 0x370   :  { %v2054_v29 = vpop.f32.mrf.mxu1 }
 0x371   :  { %v2072_v20 = vpack.c.bf16 %v2054_v29, %v2051_v14 }
 0x372   :  { %v4392_v28 = vpop.f32.mrf.mxu1 }
 0x373   :  { %4370 = vmatprep.mubr.msk.bf16.mxu0 %vm209_vm1, %v2072_v20 }
 0x374   :  { %4371 = vmatmul.mubr.msk.bf16.gmra.mxu0 %vm209_vm1, %v2073_v21  ;;  %v2315_v31 = vpop.f32.mrf.mxu1 }
 0x376   :  { %v4393_v26 = vpop.f32.mrf.mxu1 }
 0x377   :  { %v2379_v34 = vpack.c.bf16 %v4393_v26, %v4392_v28 }
 0x378   :  { %v2318_v32 = vpop.f32.mrf.mxu1 }
 0x379   :  { %v2378_v33 = vpack.c.bf16 %v2318_v32, %v2315_v31 }
 0x37a   :  { %v4396_v38 = vpop.f32.mrf.mxu1 }
 0x37b   :  { %4408 = vmatprep.mubr.msk.bf16.mxu0 %vm209_vm1, %v2378_v33 }
 0x37c   :  { %v2331_v42 = vpop.f32.mrf.mxu1  ;;  %4409 = vmatmul.mubr.msk.bf16.vlgmr.msra.gmra.mxu0 %vm209_vm1, %v2379_v34 }
 0x37d   :  { %4457 = vmatpush3.bf16.msra.mxu0 %v2725_v40 }
 0x37e   :  { %4474 = vmatprep.subr.bf16.mxu0 %v4943_v59  ;;  %v4397_v44 = vpop.f32.mrf.mxu1 }
 0x37f   :  { %v2381_v52 = vpack.c.bf16 %v4397_v44, %v4396_v38  ;;  %v4636_v44 = vld [vmem:[#allocation2 + $0x200] sm:$0xff]  }
 0x380   :  { %v2334_v46 = vpop.f32.mrf.mxu1 }
 0x381   :  { %v2380_v48 = vpack.c.bf16 %v2334_v46, %v2331_v42  ;;  %v956_v46 = vpop.f32.mrf.mxu0 }
 0x382   :  { %v4400_v4 = vpop.f32.mrf.mxu1 }
 0x383   :  { %4412 = vmatprep.mubr.msk.bf16.mxu0 %vm209_vm1, %v2380_v48 }
 0x384   :  { %v2347_v30 = vpop.f32.mrf.mxu1  ;;  %4413 = vmatmul.mubr.msk.bf16.gmra.mxu0 %vm209_vm1, %v2381_v52 }
 0x386   :  { %v4401_v22 = vpop.f32.mrf.mxu1 }
 0x387   :  { %v2383_v56 = vpack.c.bf16 %v4401_v22, %v4400_v4 }
 0x388   :  { %v2350_v53 = vpop.f32.mrf.mxu1 }
 0x389   :  { %v2382_v54 = vpack.c.bf16 %v2350_v53, %v2347_v30 }
 0x38a   :  { %v4404_v57 = vpop.f32.mrf.mxu1 }
 0x38b   :  { %4416 = vmatprep.mubr.msk.bf16.mxu0 %vm209_vm1, %v2382_v54 }
 0x38c   :  { %v2363_v62 = vpop.f32.mrf.mxu1  ;;  %4417 = vmatmul.mubr.msk.bf16.gmra.mxu0 %vm209_vm1, %v2383_v56 }
 0x38e   :  { %v4405_v61 = vpop.f32.mrf.mxu1 }
 0x38f   :  { %v2385_v37 = vpack.c.bf16 %v4405_v61, %v4404_v57 }
 0x390   :  { %v2366_v0 = vpop.f32.mrf.mxu1 }
 0x391   :  { %v2384_v1 = vpack.c.bf16 %v2366_v0, %v2363_v62 }
 0x392   :  { %v4442_v3 = vpop.f32.mrf.mxu1 }
 0x393   :  { %4420 = vmatprep.mubr.msk.bf16.mxu0 %vm209_vm1, %v2384_v1 }
 0x394   :  { %4421 = vmatmul.mubr.msk.bf16.gmra.mxu0 %vm209_vm1, %v2385_v37  ;;  %v2627_v50 = vpop.f32.mrf.mxu1 }
 0x396   :  { %v4443_v6 = vpop.f32.mrf.mxu1 }
 0x397   :  { %v2691_v13 = vpack.c.bf16 %v4443_v6, %v4442_v3 }
 0x398   :  { %v2630_v43 = vpop.f32.mrf.mxu1 }
 0x399   :  { %v2690_v55 = vpack.c.bf16 %v2630_v43, %v2627_v50 }
 0x39a   :  { %v4446_v14 = vpop.f32.mrf.mxu1 }
 0x39b   :  { %4458 = vmatprep.mubr.msk.bf16.mxu0 %vm209_vm1, %v2690_v55 }
 0x39c   :  { %v2643_v27 = vpop.f32.mrf.mxu1  ;;  %4459 = vmatmul.mubr.msk.bf16.vlgmr.msra.gmra.mxu0 %vm209_vm1, %v2691_v13 }
 0x39d   :  { %4475 = vmatpush3.bf16.msra.mxu0 %v4943_v59 }
 0x39e   :  { %4476 = vmatprep.subr.bf16.mxu0 %v4947_v63  ;;  %v4447_v29 = vpop.f32.mrf.mxu1 }
 0x39f   :  { %v2693_v28 = vpack.c.bf16 %v4447_v29, %v4446_v14 }
 0x3a0   :  { %v2646_v20 = vpop.f32.mrf.mxu1 }
 0x3a1   :  { %v2692_v21 = vpack.c.bf16 %v2646_v20, %v2643_v27  ;;  %4477 = vmatpush3.bf16.msra.mxu0 %v4947_v63 }
 0x3a2   :  { %4478 = vmatprep.subr.bf16.mxu0 %v4961_v5  ;;  %v4450_v31 = vpop.f32.mrf.mxu1 }
 0x3a3   :  { %4462 = vmatprep.mubr.msk.bf16.mxu0 %vm209_vm1, %v2692_v21 }
 0x3a4   :  { %v2659_v26 = vpop.f32.mrf.mxu1  ;;  %4463 = vmatmul.mubr.msk.bf16.gmra.mxu0 %vm209_vm1, %v2693_v28 }
 0x3a5   :  { %4479 = vmatpush3.bf16.msra.mxu0 %v4961_v5 }
 0x3a6   :  { %4480 = vmatprep.subr.bf16.mxu0 %v4973_v11  ;;  %v4451_v59 = vpop.f32.mrf.mxu1 }
 0x3a7   :  { %v2695_v34 = vpack.c.bf16 %v4451_v59, %v4450_v31 }
 0x3a8   :  { %v2662_v32 = vpop.f32.mrf.mxu1 }
 0x3a9   :  { %v2694_v33 = vpack.c.bf16 %v2662_v32, %v2659_v26  ;;  %4481 = vmatpush3.bf16.msra.mxu0 %v4973_v11 }
 0x3aa   :  { %4482 = vmatprep.subr.bf16.mxu0 %v4985_v17  ;;  %v4454_v63 = vpop.f32.mrf.mxu1 }
 0x3ab   :  { %4466 = vmatprep.mubr.msk.bf16.mxu0 %vm209_vm1, %v2694_v33 }
 0x3ac   :  { %v2675_v38 = vpop.f32.mrf.mxu1  ;;  %4467 = vmatmul.mubr.msk.bf16.gmra.mxu0 %vm209_vm1, %v2695_v34 }
 0x3ad   :  { %4483 = vmatpush3.bf16.msra.mxu0 %v4985_v17  ;;  %v4637_v17 = vld [vmem:[#allocation2 + $0x208] sm:$0xff]  }
 0x3ae   :  { %4484 = vmatprep.subr.bf16.mxu0 %v4997_v23  ;;  %v4455_v5 = vpop.f32.mrf.mxu1 }
 0x3af   :  { %v2697_v11 = vpack.c.bf16 %v4455_v5, %v4454_v63 }
 0x3b0   :  { %v2678_v40 = vpop.f32.mrf.mxu1 }
 0x3b1   :  { %v2696_v42 = vpack.c.bf16 %v2678_v40, %v2675_v38  ;;  %4485 = vmatpush3.bf16.msra.mxu0 %v4997_v23  ;;  %v941_v38 = vadd.f32 %v5192_v9, %v5190_v8  ;;  %v909_v8 = vadd.f32 %v5164_v51, %v5162_v49 }
 0x3b2   :  { %4486 = vmatprep.subr.bf16.mxu0 %v5003_v24 }
 0x3b3   :  { %4470 = vmatprep.mubr.msk.bf16.mxu0 %vm209_vm1, %v2696_v42 }
 0x3b4   :  { %4471 = vmatmul.mubr.msk.bf16.gmra.mxu0 %vm209_vm1, %v2697_v11 }
 0x3b5   :  { %4487 = vmatpush3.bf16.msra.mxu0 %v5003_v24  ;;  %4490 = vmatprep.mubr.bf16.mxu0 %v4636_v44 }
 0x3b6   :  { %4488 = vmatprep.subr.bf16.mxu0 %v5009_v25 }
 0x3b9   :  { %4489 = vmatpush3.bf16.msra.mxu0 %v5009_v25 }
 0x3bc   :  { %v4210_v48 = vpop.f32.mrf.mxu0  ;;  %4491 = vmatmul.mubr.bf16.vlgmr.msra.gmra.mxu0 %v4637_v17 }
 0x3bd   :  { %v1266_v23 = vadd.f32 %v4210_v48, %v5152_v36 }
 0x3be   :  { %v1201_v52 = vpop.f32.mrf.mxu0 }
 0x3bf   :  { %v1264_v4 = vadd.f32 %v1201_v52, %v5156_v41 }
 0x3c0   :  { %v4211_v30 = vpop.f32.mrf.mxu0 }
 0x3c1   :  { %v1267_v22 = vadd.f32 %v4211_v30, %v5158_v47 }
 0x3c2   :  { %v5294_v53 = vpop.f32.mrf.mxu0 }
 0x3c4   :  { %v4214_v24 = vpop.f32.mrf.mxu0 }
 0x3c5   :  { %v1270_v54 = vadd.f32 %v4214_v24, %v5166_v45 }
 0x3c6   :  { %v1217_v56 = vpop.f32.mrf.mxu0 }
 0x3c7   :  { %v1268_v57 = vadd.f32 %v1217_v56, %v5170_v39 }
 0x3c8   :  { %v4215_v25 = vpop.f32.mrf.mxu0 }
 0x3c9   :  { %v1271_v62 = vadd.f32 %v4215_v25, %v5172_v58  ;;  %v3796_v25 = vld [vmem:[%s5761_s2 + $0x20] sm:$0xf] }
 0x3ca   :  { %v1220_v61 = vpop.f32.mrf.mxu0  ;;  %4566 = vmatprep.subr.msk.bf16.mxu0 %vm743_vm2, %v3796_v25 }
 0x3cc   :  { %v4218_v0 = vpop.f32.mrf.mxu0 }
 0x3cd   :  { %v1274_v36 = vadd.f32 %v4218_v0, %v5180_v15 }
 0x3ce   :  { %v1233_v1 = vpop.f32.mrf.mxu0 }
 0x3cf   :  { %v1272_v41 = vadd.f32 %v1233_v1, %v5184_v2 }
 0x3d0   :  { %v4219_v37 = vpop.f32.mrf.mxu0 }
 0x3d1   :  { %v1275_v47 = vadd.f32 %v4219_v37, %v5186_v7 }
 0x3d2   :  { %v1236_v3 = vpop.f32.mrf.mxu0 }
 0x3d3   :  { %v1273_v42 = vadd.f32 %v1236_v3, %v941_v38 }
 0x3d4   :  { %v4222_v50 = vpop.f32.mrf.mxu0 }
 0x3d5   :  { %v1278_v45 = vadd.f32 %v4222_v50, %v5194_v12  ;;  %v925_v12 = vadd.f32 %v5178_v60, %v5176_v10 }
 0x3d6   :  { %v1249_v6 = vpop.f32.mrf.mxu0 }
 0x3d7   :  { %v1276_v39 = vadd.f32 %v1249_v6, %v5198_v16  ;;  %v1269_v16 = vadd.f32 %v1220_v61, %v925_v12 }
 0x3d8   :  { %v4223_v43 = vpop.f32.mrf.mxu0 }
 0x3d9   :  { %v1279_v58 = vadd.f32 %v4223_v43, %v5200_v18 }
 0x3da   :  { %v1252_v55 = vpop.f32.mrf.mxu0 }
 0x3dc   :  { %v4260_v13 = vpop.f32.mrf.mxu0 }
 0x3dd   :  { %v1578_v14 = vadd.f32 %v4260_v13, %v1266_v23  ;;  %v957_v23 = vadd.f32 %v956_v46, %v5203_v19  ;;  %v3037_v19 = vsel %vm743_vm2, %v3796_v25, 0 }
 0x3de   :  { %v1513_v15 = vpop.f32.mrf.mxu0  ;;  %4507 = vmatpush3.bf16.msra.mxu0 %v3037_v19 }
 0x3df   :  { %v1576_v27 = vadd.f32 %v1513_v15, %v1264_v4  ;;  %v1277_v30 = vadd.f32 %v1252_v55, %v957_v23 }
 0x3e0   :  { %v4261_v29 = vpop.f32.mrf.mxu0 }
 0x3e1   :  { %v1579_v2 = vadd.f32 %v4261_v29, %v1267_v22 }
 0x3e2   :  { %v1516_v20 = vpop.f32.mrf.mxu0 }
 0x3e4   :  { %v4264_v21 = vpop.f32.mrf.mxu0 }
 0x3e5   :  { %v1582_v7 = vadd.f32 %v4264_v21, %v1270_v54 }
 0x3e6   :  { %v1529_v28 = vpop.f32.mrf.mxu0 }
 0x3e7   :  { %v1580_v31 = vadd.f32 %v1529_v28, %v1268_v57 }
 0x3e8   :  { %v4265_v26 = vpop.f32.mrf.mxu0 }
 0x3e9   :  { %v1583_v59 = vadd.f32 %v4265_v26, %v1271_v62  ;;  %v1265_v62 = vadd.f32 %v5294_v53, %v909_v8 }
 0x3ea   :  { %v1532_v32 = vpop.f32.mrf.mxu0 }
 0x3eb   :  { %v1581_v18 = vadd.f32 %v1532_v32, %v1269_v16  ;;  %v1577_v0 = vadd.f32 %v1516_v20, %v1265_v62 }
 0x3ec   :  { %v4268_v33 = vpop.f32.mrf.mxu0 }
 0x3ed   :  { %v1586_v34 = vadd.f32 %v4268_v33, %v1274_v36 }
 0x3ee   :  { %v1545_v63 = vpop.f32.mrf.mxu0 }
 0x3ef   :  { %v1584_v5 = vadd.f32 %v1545_v63, %v1272_v41 }
 0x3f0   :  { %v4269_v40 = vpop.f32.mrf.mxu0 }
 0x3f1   :  { %v1587_v44 = vadd.f32 %v4269_v40, %v1275_v47 }
 0x3f2   :  { %v1548_v11 = vpop.f32.mrf.mxu0 }
 0x3f3   :  { %v1585_v17 = vadd.f32 %v1548_v11, %v1273_v42 }
 0x3f4   :  { %v4272_v48 = vpop.f32.mrf.mxu0 }
 0x3f5   :  { %v1590_v10 = vadd.f32 %v4272_v48, %v1278_v45 }
 0x3f6   :  { %v1561_v60 = vpop.f32.mrf.mxu0 }
 0x3f7   :  { %v1588_v52 = vadd.f32 %v1561_v60, %v1276_v39 }
 0x3f8   :  { %v4273_v4 = vpop.f32.mrf.mxu0 }
 0x3f9   :  { %v1591_v22 = vadd.f32 %v4273_v4, %v1279_v58 }
 0x3fa   :  { %v1564_v24 = vpop.f32.mrf.mxu0 }
 0x3fb   :  { %v1589_v54 = vadd.f32 %v1564_v24, %v1277_v30 }
 0x3fc   :  { %v4310_v56 = vpop.f32.mrf.mxu0 }
 0x3fd   :  { %v1890_v9 = vadd.f32 %v4310_v56, %v1578_v14 }
 0x3fe   :  { %v1825_v57 = vpop.f32.mrf.mxu0 }
 0x3ff   :  { %v1888_v61 = vadd.f32 %v1825_v57, %v1576_v27 }
 0x400   :  { %v4311_v46 = vpop.f32.mrf.mxu0 }
 0x401   :  { %v1891_v36 = vadd.f32 %v4311_v46, %v1579_v2 }
 0x402   :  { %v1828_v1 = vpop.f32.mrf.mxu0 }
 0x403   :  { %v1889_v41 = vadd.f32 %v1828_v1, %v1577_v0 }
 0x404   :  { %v4314_v49 = vpop.f32.mrf.mxu0 }
 0x405   :  { %v1894_v51 = vadd.f32 %v4314_v49, %v1582_v7 }
 0x406   :  { %v1841_v37 = vpop.f32.mrf.mxu0 }
 0x407   :  { %v1892_v47 = vadd.f32 %v1841_v37, %v1580_v31 }
 0x408   :  { %v4315_v3 = vpop.f32.mrf.mxu0 }
 0x409   :  { %v1895_v50 = vadd.f32 %v4315_v3, %v1583_v59 }
 0x40a   :  { %v1844_v45 = vpop.f32.mrf.mxu0 }
 0x40b   :  { %v1893_v6 = vadd.f32 %v1844_v45, %v1581_v18 }
 0x40c   :  { %v4318_v53 = vpop.f32.mrf.mxu0 }
 0x40d   :  { %v1898_v39 = vadd.f32 %v4318_v53, %v1586_v34 }
 0x40e   :  { %v1857_v43 = vpop.f32.mrf.mxu0 }
 0x40f   :  { %v1896_v58 = vadd.f32 %v1857_v43, %v1584_v5 }
 0x410   :  { %v4319_v55 = vpop.f32.mrf.mxu0 }
 0x411   :  { %v1899_v13 = vadd.f32 %v4319_v55, %v1587_v44 }
 0x412   :  { %v1860_v14 = vpop.f32.mrf.mxu0 }
 0x413   :  { %v1897_v15 = vadd.f32 %v1860_v14, %v1585_v17 }
 0x414   :  { %v4322_v27 = vpop.f32.mrf.mxu0 }
 0x415   :  { %v1902_v29 = vadd.f32 %v4322_v27, %v1590_v10 }
 0x416   :  { %v1873_v2 = vpop.f32.mrf.mxu0 }
 0x417   :  { %v1900_v20 = vadd.f32 %v1873_v2, %v1588_v52 }
 0x418   :  { %v4323_v21 = vpop.f32.mrf.mxu0 }
 0x419   :  { %v1903_v7 = vadd.f32 %v4323_v21, %v1591_v22 }
 0x41a   :  { %v1876_v28 = vpop.f32.mrf.mxu0 }
 0x41b   :  { %v1901_v12 = vadd.f32 %v1876_v28, %v1589_v54 }
 0x41c   :  { %v4360_v31 = vpop.f32.mrf.mxu0 }
 0x41d   :  { %v2202_v26 = vadd.f32 %v4360_v31, %v1890_v9 }
 0x41e   :  { %v2137_v16 = vpop.f32.mrf.mxu0 }
 0x41f   :  { %v2200_v59 = vadd.f32 %v2137_v16, %v1888_v61 }
 0x420   :  { %v4361_v32 = vpop.f32.mrf.mxu0 }
 0x421   :  { %v2203_v18 = vadd.f32 %v4361_v32, %v1891_v36 }
 0x422   :  { %v2140_v33 = vpop.f32.mrf.mxu0 }
 0x423   :  { %v2201_v34 = vadd.f32 %v2140_v33, %v1889_v41 }
 0x424   :  { %v4364_v63 = vpop.f32.mrf.mxu0 }
 0x425   :  { %v2206_v38 = vadd.f32 %v4364_v63, %v1894_v51 }
 0x426   :  { %v2153_v5 = vpop.f32.mrf.mxu0 }
 0x427   :  { %v2204_v40 = vadd.f32 %v2153_v5, %v1892_v47  ;;  %v4496_v5 = vpop.f32.mrf.mxu1 }
 0x428   :  { %v4365_v42 = vpop.f32.mrf.mxu0 }
 0x429   :  { %v2207_v44 = vadd.f32 %v4365_v42, %v1895_v50 }
 0x42a   :  { %v2156_v11 = vpop.f32.mrf.mxu0 }
 0x42b   :  { %v2205_v17 = vadd.f32 %v2156_v11, %v1893_v6 }
 0x42c   :  { %v4368_v48 = vpop.f32.mrf.mxu0 }
 0x42d   :  { %v2210_v10 = vadd.f32 %v4368_v48, %v1898_v39 }
 0x42e   :  { %v2169_v60 = vpop.f32.mrf.mxu0 }
 0x42f   :  { %v2208_v23 = vadd.f32 %v2169_v60, %v1896_v58 }
 0x430   :  { %v4369_v52 = vpop.f32.mrf.mxu0 }
 0x431   :  { %v2211_v4 = vadd.f32 %v4369_v52, %v1899_v13 }
 0x432   :  { %v2172_v30 = vpop.f32.mrf.mxu0 }
 0x433   :  { %v2209_v22 = vadd.f32 %v2172_v30, %v1897_v15 }
 0x434   :  { %v4372_v24 = vpop.f32.mrf.mxu0 }
 0x435   :  { %v2214_v54 = vadd.f32 %v4372_v24, %v1902_v29 }
 0x436   :  { %v2185_v56 = vpop.f32.mrf.mxu0 }
 0x437   :  { %v2212_v8 = vadd.f32 %v2185_v56, %v1900_v20 }
 0x438   :  { %v4373_v9 = vpop.f32.mrf.mxu0 }
 0x439   :  { %v2215_v57 = vadd.f32 %v4373_v9, %v1903_v7 }
 0x43a   :  { %v2188_v25 = vpop.f32.mrf.mxu0 }
 0x43b   :  { %v2213_v62 = vadd.f32 %v2188_v25, %v1901_v12 }
 0x43c   :  { %v4410_v61 = vpop.f32.mrf.mxu0 }
 0x43d   :  { %v2514_v19 = vadd.f32 %v4410_v61, %v2202_v26 }
 0x43e   :  { %v2449_v46 = vpop.f32.mrf.mxu0 }
 0x43f   :  { %v2512_v0 = vadd.f32 %v2449_v46, %v2200_v59 }
 0x440   :  { %v4411_v36 = vpop.f32.mrf.mxu0 }
 0x441   :  { %v2515_v1 = vadd.f32 %v4411_v36, %v2203_v18 }
 0x442   :  { %v2452_v41 = vpop.f32.mrf.mxu0 }
 0x443   :  { %v2513_v49 = vadd.f32 %v2452_v41, %v2201_v34 }
 0x444   :  { %v4414_v51 = vpop.f32.mrf.mxu0 }
 0x445   :  { %v2518_v37 = vadd.f32 %v4414_v51, %v2206_v38 }
 0x446   :  { %v2465_v47 = vpop.f32.mrf.mxu0 }
 0x447   :  { %v2516_v3 = vadd.f32 %v2465_v47, %v2204_v40 }
 0x448   :  { %v4415_v50 = vpop.f32.mrf.mxu0 }
 0x449   :  { %v2519_v45 = vadd.f32 %v4415_v50, %v2207_v44 }
 0x44a   :  { %v2468_v6 = vpop.f32.mrf.mxu0 }
 0x44b   :  { %v2517_v53 = vadd.f32 %v2468_v6, %v2205_v17  ;;  %v2955_v17 = vpop.f32.mrf.mxu1 }
 0x44c   :  { %v4418_v39 = vpop.f32.mrf.mxu0 }
 0x44d   :  { %v2522_v43 = vadd.f32 %v4418_v39, %v2210_v10  ;;  %v4497_v52 = vpop.f32.mrf.mxu1 }
 0x44e   :  { %v2481_v58 = vpop.f32.mrf.mxu0 }
 0x44f   :  { %v2520_v55 = vadd.f32 %v2481_v58, %v2208_v23 }
 0x450   :  { %v4419_v13 = vpop.f32.mrf.mxu0 }
 0x451   :  { %v2523_v14 = vadd.f32 %v4419_v13, %v2211_v4 }
 0x452   :  { %v2484_v15 = vpop.f32.mrf.mxu0 }
 0x453   :  { %v2521_v27 = vadd.f32 %v2484_v15, %v2209_v22 }
 0x454   :  { %v4422_v29 = vpop.f32.mrf.mxu0 }
 0x455   :  { %v2526_v2 = vadd.f32 %v4422_v29, %v2214_v54  ;;  %v2958_v54 = vpop.f32.mrf.mxu1 }
 0x456   :  { %v2497_v20 = vpop.f32.mrf.mxu0  ;;  %v3004_v6 = vpack.c.bf16 %v2958_v54, %v2955_v17 }
 0x457   :  { %v2524_v21 = vadd.f32 %v2497_v20, %v2212_v8  ;;  %v4500_v25 = vpop.f32.mrf.mxu1 }
 0x458   :  { %v4423_v7 = vpop.f32.mrf.mxu0 }
 0x459   :  { %v2527_v28 = vadd.f32 %v4423_v7, %v2215_v57 }
 0x45a   :  { %v2500_v12 = vpop.f32.mrf.mxu0 }
 0x45b   :  { %v2525_v31 = vadd.f32 %v2500_v12, %v2213_v62 }
 0x45c   :  { %v4460_v26 = vpop.f32.mrf.mxu0 }
 0x45d   :  { %v5318_v16 = vadd.f32 %v4460_v26, %v2514_v19 }
 0x45e   :  { %v2761_v59 = vpop.f32.mrf.mxu0 }
 0x45f   :  { %v5320_v32 = vadd.f32 %v2761_v59, %v2512_v0  ;;  %v2971_v0 = vpop.f32.mrf.mxu1 }
 0x460   :  { %v4461_v18 = vpop.f32.mrf.mxu0 }
 0x461   :  { %v5322_v33 = vadd.f32 %v4461_v18, %v2515_v1  ;;  %v4501_v51 = vpop.f32.mrf.mxu1 }
 0x462   :  { %v2764_v34 = vpop.f32.mrf.mxu0 }
 0x463   :  { %v5324_v63 = vadd.f32 %v2764_v34, %v2513_v49 }
 0x464   :  { %v4464_v38 = vpop.f32.mrf.mxu0 }
 0x465   :  { %v5326_v40 = vadd.f32 %v4464_v38, %v2518_v37 }
 0x466   :  { %v2777_v42 = vpop.f32.mrf.mxu0 }
 0x467   :  { %v5328_v44 = vadd.f32 %v2777_v42, %v2516_v3  ;;  %v2974_v3 = vpop.f32.mrf.mxu1 }
 0x468   :  { %v4465_v11 = vpop.f32.mrf.mxu0  ;;  %v3006_v58 = vpack.c.bf16 %v2974_v3, %v2971_v0 }
 0x469   :  { %v5330_v48 = vadd.f32 %v4465_v11, %v2519_v45  ;;  %v4504_v39 = vpop.f32.mrf.mxu1 }
 0x46a   :  { %v2780_v10 = vpop.f32.mrf.mxu0 }
 0x46b   :  { %v5332_v60 = vadd.f32 %v2780_v10, %v2517_v53 }
 0x46c   :  { %v4468_v23 = vpop.f32.mrf.mxu0 }
 0x46d   :  { %v5334_v4 = vadd.f32 %v4468_v23, %v2522_v43  ;;  %v2987_v43 = vpop.f32.mrf.mxu1 }
 0x46e   :  { %v2793_v30 = vpop.f32.mrf.mxu0 }
 0x46f   :  { %v5336_v22 = vadd.f32 %v2793_v30, %v2520_v55  ;;  %v3005_v55 = vpack.c.bf16 %v4497_v52, %v4496_v5  ;;  %v4505_v13 = vpop.f32.mrf.mxu1 }
 0x470   :  { %v4469_v24 = vpop.f32.mrf.mxu0  ;;  %v3009_v29 = vpack.c.bf16 %v4505_v13, %v4504_v39 }
 0x471   :  { %v5338_v56 = vadd.f32 %v4469_v24, %v2523_v14  ;;  %v2990_v14 = vpop.f32.mrf.mxu1 }
 0x472   :  { %v2796_v8 = vpop.f32.mrf.mxu0  ;;  %v3008_v15 = vpack.c.bf16 %v2990_v14, %v2987_v43 }
 0x473   :  { %v5340_v9 = vadd.f32 %v2796_v8, %v2521_v27  ;;  %v3007_v27 = vpack.c.bf16 %v4501_v51, %v4500_v25 }
 0x474   :  { %v4472_v57 = vpop.f32.mrf.mxu0 }
 0x475   :  { %v5342_v62 = vadd.f32 %v4472_v57, %v2526_v2  ;;  %v3321_v2 = vld [vmem:[%s5762_s3] sm:$0xf] }
 0x476   :  { %v2809_v61 = vpop.f32.mrf.mxu0  ;;  %4567 = vmatprep.subr.msk.bf16.mxu1 %vm743_vm2, %v3321_v2  ;;  %v3347_v20 = vsel %vm743_vm2, %v3321_v2, 0 }
 0x477   :  { %v5344_v19 = vadd.f32 %v2809_v61, %v2524_v21  ;;  %4525 = vmatpush3.bf16.msra.mxu1 %v3347_v20 }
 0x478   :  { %v4473_v46 = vpop.f32.mrf.mxu0 }
 0x479   :  { %v5346_v36 = vadd.f32 %v4473_v46, %v2527_v28 }
 0x47a   :  { %v2812_v1 = vpop.f32.mrf.mxu0 }
 0x47b   :  { %v5348_v41 = vadd.f32 %v2812_v1, %v2525_v31 }
 0x47c   :  { %v4492_v49 = vpop.f32.mrf.mxu0 }
 0x47e   :  { %v2939_v37 = vpop.f32.mrf.mxu0 }
 0x480   :  { %v4493_v47 = vpop.f32.mrf.mxu0 }
 0x481   :  { %v3003_v53 = vpack.c.bf16 %v4493_v47, %v4492_v49 }
 0x482   :  { %v2942_v50 = vpop.f32.mrf.mxu0 }
 0x483   :  { %v3002_v45 = vpack.c.bf16 %v2942_v50, %v2939_v37 }
 0x485   :  { %4508 = vmatprep.mubr.msk.bf16.mxu0 %vm209_vm1, %v3002_v45 }
 0x486   :  { %4509 = vmatmul.mubr.msk.bf16.vlgmr.msra.gmra.mxu0 %vm209_vm1, %v3003_v53 }
 0x487   :  { %4512 = vmatprep.mubr.msk.bf16.mxu0 %vm209_vm1, %v3004_v6 }
 0x48e   :  { %4513 = vmatmul.mubr.msk.bf16.gmra.mxu0 %vm209_vm1, %v3005_v55 }
 0x48f   :  { %4516 = vmatprep.mubr.msk.bf16.mxu0 %vm209_vm1, %v3006_v58 }
 0x496   :  { %4517 = vmatmul.mubr.msk.bf16.gmra.mxu0 %vm209_vm1, %v3007_v27 }
 0x497   :  { %4520 = vmatprep.mubr.msk.bf16.mxu0 %vm209_vm1, %v3008_v15 }
 0x49e   :  { %4521 = vmatmul.mubr.msk.bf16.gmra.mxu0 %vm209_vm1, %v3009_v29 }
 0x546   :  { %v4510_v21 = vpop.f32.mrf.mxu0 }
 0x547   :  { %v5367_v31 = vadd.f32 %v4510_v21, %v5318_v16 }
 0x548   :  { %v3073_v7 = vpop.f32.mrf.mxu0 }
 0x549   :  { %v5364_v28 = vadd.f32 %v3073_v7, %v5320_v32  ;;  %v3193_v5 = vmul.f32 %v5367_v31, %v5367_v31 }
 0x54a   :  { %v4511_v12 = vpop.f32.mrf.mxu0 }
 0x54b   :  { %v3191_v59 = vmul.f32 %v5364_v28, %v5364_v28  ;;  %v5372_v18 = vadd.f32 %v4511_v12, %v5322_v33  ;;  %v3154_v32 = vsel %vm209_vm1, %v5364_v28, 0.0  ;;  %v3157_v33 = vsel %vm209_vm1, %v5367_v31, 0.0 }
 0x54c   :  { %v3076_v26 = vpop.f32.mrf.mxu0  ;;  %v3210_v8 = vsel %vm209_vm1, %v3193_v5, 0.0 }
 0x54d   :  { %v5375_v34 = vadd.f32 %v3076_v26, %v5324_v63  ;;  %v3207_v63 = vsel %vm209_vm1, %v3191_v59, 0.0  ;;  %v3194_v10 = vmul.f32 %v5372_v18, %v5372_v18  ;;  %v3159_v57 = vsel %vm209_vm1, %v5372_v18, 0.0 }
 0x54e   :  { %v4514_v38 = vpop.f32.mrf.mxu0 }
 0x54f   :  { %v3155_v16 = vsel %vm209_vm1, %v5375_v34, 0.0  ;;  %v3192_v42 = vmul.f32 %v5375_v34, %v5375_v34  ;;  %v5398_v25 = vadd.f32 %v4514_v38, %v5326_v40 }
 0x550   :  { %v3156_v11 = vadd.f32 %v3155_v16, %v3154_v32  ;;  %v3089_v17 = vpop.f32.mrf.mxu0 }
 0x551   :  { %v3208_v23 = vsel %vm209_vm1, %v3192_v42, 0.0  ;;  %v5392_v52 = vadd.f32 %v3089_v17, %v5328_v44  ;;  %v3212_v44 = vsel %vm209_vm1, %v3194_v10, 0.0  ;;  %v3197_v50 = vmul.f32 %v5398_v25, %v5398_v25 }
 0x552   :  { %v3158_v30 = vadd.f32 %v3157_v33, %v3156_v11  ;;  %v3209_v24 = vadd.f32 %v3208_v23, %v3207_v63  ;;  %v4515_v54 = vpop.f32.mrf.mxu0 }
 0x553   :  { %v3195_v61 = vmul.f32 %v5392_v52, %v5392_v52  ;;  %v3161_v49 = vsel %vm209_vm1, %v5392_v52, 0.0  ;;  %v5406_v51 = vadd.f32 %v4515_v54, %v5330_v48  ;;  %v3218_v29 = vsel %vm209_vm1, %v3197_v50, 0.0 }
 0x554   :  { %v3211_v46 = vadd.f32 %v3210_v8, %v3209_v24  ;;  %v3160_v0 = vadd.f32 %v3159_v57, %v3158_v30  ;;  %v3092_v1 = vpop.f32.mrf.mxu0 }
 0x555   :  { %v5409_v37 = vadd.f32 %v3092_v1, %v5332_v60  ;;  %v3214_v45 = vsel %vm209_vm1, %v3195_v61, 0.0  ;;  %v3165_v60 = vsel %vm209_vm1, %v5398_v25, 0.0  ;;  %v3198_v58 = vmul.f32 %v5406_v51, %v5406_v51 }
 0x556   :  { %v3162_v47 = vadd.f32 %v3161_v49, %v3160_v0  ;;  %v3213_v40 = vadd.f32 %v3212_v44, %v3211_v46  ;;  %v4518_v3 = vpop.f32.mrf.mxu0  ;;  %v3167_v2 = vsel %vm209_vm1, %v5406_v51, 0.0 }
 0x557   :  { %v3163_v6 = vsel %vm209_vm1, %v5409_v37, 0.0  ;;  %v3196_v53 = vmul.f32 %v5409_v37, %v5409_v37  ;;  %v5430_v20 = vadd.f32 %v4518_v3, %v5334_v4 }
 0x558   :  { %v3215_v39 = vadd.f32 %v3214_v45, %v3213_v40  ;;  %v3164_v48 = vadd.f32 %v3163_v6, %v3162_v47  ;;  %v3105_v43 = vpop.f32.mrf.mxu0 }
 0x559   :  { %v3216_v55 = vsel %vm209_vm1, %v3196_v53, 0.0  ;;  %v5424_v13 = vadd.f32 %v3105_v43, %v5336_v22  ;;  %v3220_v22 = vsel %vm209_vm1, %v3198_v58, 0.0  ;;  %v3201_v42 = vmul.f32 %v5430_v20, %v5430_v20 }
 0x55a   :  { %v3166_v14 = vadd.f32 %v3165_v60, %v3164_v48  ;;  %v3217_v15 = vadd.f32 %v3216_v55, %v3215_v39  ;;  %v4519_v27 = vpop.f32.mrf.mxu0 }
 0x55b   :  { %v3199_v21 = vmul.f32 %v5424_v13, %v5424_v13  ;;  %v3169_v59 = vsel %vm209_vm1, %v5424_v13, 0.0  ;;  %v5438_v38 = vadd.f32 %v4519_v27, %v5338_v56  ;;  %v3226_v61 = vsel %vm209_vm1, %v3201_v42, 0.0 }
 0x55c   :  { %v3219_v7 = vadd.f32 %v3218_v29, %v3217_v15  ;;  %v3168_v12 = vadd.f32 %v3167_v2, %v3166_v14  ;;  %v3108_v26 = vpop.f32.mrf.mxu0 }
 0x55d   :  { %v5441_v5 = vadd.f32 %v3108_v26, %v5340_v9  ;;  %v3222_v33 = vsel %vm209_vm1, %v3199_v21, 0.0  ;;  %v3173_v9 = vsel %vm209_vm1, %v5430_v20, 0.0  ;;  %v3202_v23 = vmul.f32 %v5438_v38, %v5438_v38 }
 0x55e   :  { %v3170_v32 = vadd.f32 %v3169_v59, %v3168_v12  ;;  %v3221_v4 = vadd.f32 %v3220_v22, %v3219_v7  ;;  %v4522_v16 = vpop.f32.mrf.mxu0  ;;  %v3175_v46 = vsel %vm209_vm1, %v5438_v38, 0.0 }
 0x55f   :  { %v3171_v11 = vsel %vm209_vm1, %v5441_v5, 0.0  ;;  %v3200_v17 = vmul.f32 %v5441_v5, %v5441_v5  ;;  %v5462_v0 = vadd.f32 %v4522_v16, %v5342_v62 }
 0x560   :  { %v3223_v63 = vadd.f32 %v3222_v33, %v3221_v4  ;;  %v3172_v56 = vadd.f32 %v3171_v11, %v3170_v32  ;;  %v3121_v10 = vpop.f32.mrf.mxu0 }
 0x561   :  { %v3224_v30 = vsel %vm209_vm1, %v3200_v17, 0.0  ;;  %v5456_v24 = vadd.f32 %v3121_v10, %v5344_v19  ;;  %v3228_v19 = vsel %vm209_vm1, %v3202_v23, 0.0  ;;  %v3205_v62 = vmul.f32 %v5462_v0, %v5462_v0 }
 0x562   :  { %v3174_v54 = vadd.f32 %v3173_v9, %v3172_v56  ;;  %v3225_v8 = vadd.f32 %v3224_v30, %v3223_v63  ;;  %v4523_v57 = vpop.f32.mrf.mxu0  ;;  %v3181_v58 = vsel %vm209_vm1, %v5462_v0, 0.0 }
 0x563   :  { %v3203_v1 = vmul.f32 %v5456_v24, %v5456_v24  ;;  %v3177_v40 = vsel %vm209_vm1, %v5456_v24, 0.0  ;;  %v5470_v3 = vadd.f32 %v4523_v57, %v5346_v36  ;;  %v3234_v15 = vsel %vm209_vm1, %v3205_v62, 0.0 }
 0x564   :  { %v3227_v44 = vadd.f32 %v3226_v61, %v3225_v8  ;;  %v3176_v49 = vadd.f32 %v3175_v46, %v3174_v54  ;;  %v3124_v47 = vpop.f32.mrf.mxu0  ;;  %v3152_v54 = vld [vmem:[%s5766_s7] sm:$0x1] }
 0x565   :  { %v3149_v50 = vadd.f32 %v3124_v47, %v5348_v41  ;;  %v3230_v53 = vsel %vm209_vm1, %v3203_v1, 0.0  ;;  %v3206_v36 = vmul.f32 %v5470_v3, %v5470_v3  ;;  %v3183_v27 = vsel %vm209_vm1, %v5470_v3, 0.0  ;;  %v3153_v61 = vld [vmem:[%s5767_s8] sm:$0x1] }
 0x566   :  { %v3178_v45 = vadd.f32 %v3177_v40, %v3176_v49  ;;  %v3229_v6 = vadd.f32 %v3228_v19, %v3227_v44 }
 0x567   :  { %v3179_v39 = vsel %vm209_vm1, %v3149_v50, 0.0  ;;  %v3204_v48 = vmul.f32 %v3149_v50, %v3149_v50  ;;  %v3236_v21 = vsel %vm209_vm1, %v3206_v36, 0.0 }
 0x568   :  { %v3231_v43 = vadd.f32 %v3230_v53, %v3229_v6  ;;  %v3180_v60 = vadd.f32 %v3179_v39, %v3178_v45 }
 0x569   :  { %v3232_v41 = vsel %vm209_vm1, %v3204_v48, 0.0 }
 0x56a   :  { %v3182_v55 = vadd.f32 %v3181_v58, %v3180_v60  ;;  %v3233_v14 = vadd.f32 %v3232_v41, %v3231_v43 }
 0x56c   :  { %v3184_v29 = vadd.f32 %v3183_v27, %v3182_v55  ;;  %v3235_v2 = vadd.f32 %v3234_v15, %v3233_v14 }
 0x56e   :  { %v3185_v7 = vrot.slane %v3184_v29, 4  ;;  %v3237_v12 = vadd.f32 %v3236_v21, %v3235_v2 }
 0x570   :  { %v3186_v26 = vadd.f32 %v3185_v7, %v3184_v29  ;;  %v3238_v22 = vrot.slane %v3237_v12, 4 }
 0x572   :  { %v3187_v59 = vrot.slane %v3186_v26, 2  ;;  %v3239_v32 = vadd.f32 %v3238_v22, %v3237_v12 }
 0x574   :  { %v3188_v4 = vadd.f32 %v3187_v59, %v3186_v26  ;;  %v3240_v16 = vrot.slane %v3239_v32, 2 }
 0x576   :  { %v3189_v42 = vrot.slane %v3188_v4, 1  ;;  %v3241_v33 = vadd.f32 %v3240_v16, %v3239_v32 }
 0x578   :  { %v3190_v11 = vadd.f32 %v3189_v42, %v3188_v4  ;;  %v3242_v17 = vrot.slane %v3241_v33, 1 }
 0x57a   :  { %v3243_v63 = vadd.f32 %v3242_v17, %v3241_v33  ;;  %v3244_v56 = vmul.f32 0.0078125, %v3190_v11 }
 0x57c   :  { %v3245_v10 = vmul.f32 0.0078125, %v3243_v63  ;;  %v3246_v9 = vmul.f32 %v3244_v56, %v3244_v56 }
 0x57e   :  { %v3247_v23 = vsub.f32 %v3245_v10, %v3246_v9 }
 0x580   :  { %v3248_v30 = vadd.f32 1e-05, %v3247_v23 }
 0x582   :  { %4646 = vrsqrt.f32 %v3248_v30 }
 0x58f   :  { %v4647_v8 = vpop.eup %4646 }
 0x590   :  { %v3250_v57 = vmul.f32 %v4647_v8, %v3152_v54 }
 0x592   :  { %v3251_v46 = vmul.f32 %v3250_v57, %v3244_v56  ;;  %v3257_v1 = vrot.slane %v3250_v57, %v4916_v35 }
 0x594   :  { %v3252_v44 = vsub.f32 %v3153_v61, %v3251_v46  ;;  %v3272_v49 = vmul.f32 %v3257_v1, %v3149_v50  ;;  %v3259_v47 = vmul.f32 %v3257_v1, %v5364_v28  ;;  %v3260_v19 = vmul.f32 %v3257_v1, %v5375_v34 }
 0x595   :  { %v3261_v40 = vmul.f32 %v3257_v1, %v5367_v31  ;;  %v3262_v45 = vmul.f32 %v3257_v1, %v5372_v18  ;;  %v3263_v6 = vmul.f32 %v3257_v1, %v5392_v52  ;;  %v3264_v62 = vmul.f32 %v3257_v1, %v5409_v37 }
 0x596   :  { %v3279_v53 = vrot.slane %v3252_v44, %v4916_v35  ;;  %v3265_v39 = vmul.f32 %v3257_v1, %v5398_v25  ;;  %v3266_v48 = vmul.f32 %v3257_v1, %v5406_v51  ;;  %v3267_v50 = vmul.f32 %v3257_v1, %v5424_v13 }
 0x597   :  { %v3268_v28 = vmul.f32 %v3257_v1, %v5441_v5  ;;  %v3269_v34 = vmul.f32 %v3257_v1, %v5430_v20  ;;  %v3270_v31 = vmul.f32 %v3257_v1, %v5438_v38  ;;  %v3271_v18 = vmul.f32 %v3257_v1, %v5456_v24 }
 0x598   :  { %v3294_v43 = vadd.f32 %v3279_v53, %v3272_v49  ;;  %v3281_v52 = vadd.f32 %v3279_v53, %v3259_v47  ;;  %v3282_v60 = vadd.f32 %v3279_v53, %v3260_v19  ;;  %v3283_v37 = vadd.f32 %v3279_v53, %v3261_v40 }
 0x599   :  { %v3284_v58 = vadd.f32 %v3279_v53, %v3262_v45  ;;  %v3285_v36 = vadd.f32 %v3279_v53, %v3263_v6  ;;  %v3286_v41 = vadd.f32 %v3279_v53, %v3264_v62  ;;  %v3287_v25 = vadd.f32 %v3279_v53, %v3265_v39 }
 0x59a   :  { %v3310_v55 = vmax.f32 %v3294_v43, 0.0  ;;  %v3297_v51 = vmax.f32 %v3281_v52, 0.0  ;;  %v3298_v14 = vmax.f32 %v3282_v60, 0.0  ;;  %v3299_v13 = vmax.f32 %v3283_v37, 0.0 }
 0x59b   :  { %v3300_v15 = vmax.f32 %v3284_v58, 0.0  ;;  %v3301_v5 = vmax.f32 %v3285_v36, 0.0  ;;  %v3302_v27 = vmax.f32 %v3286_v41, 0.0  ;;  %v3288_v20 = vadd.f32 %v3279_v53, %v3266_v48 }
 0x59c   :  { %v3313_v29 = vpack.c.bf16 %v3298_v14, %v3297_v51  ;;  %v3303_v38 = vmax.f32 %v3287_v25, 0.0  ;;  %v3289_v2 = vadd.f32 %v3279_v53, %v3267_v50  ;;  %v3290_v24 = vadd.f32 %v3279_v53, %v3268_v28 }
 0x59d   :  { %v3314_v21 = vpack.c.bf16 %v3300_v15, %v3299_v13  ;;  %v3315_v7 = vpack.c.bf16 %v3302_v27, %v3301_v5  ;;  %v3304_v12 = vmax.f32 %v3288_v20, 0.0  ;;  %v3291_v26 = vadd.f32 %v3279_v53, %v3269_v34 }
 0x59e   :  { %4526 = vmatprep.mubr.msk.bf16.mxu1 %vm209_vm1, %v3313_v29  ;;  %v3305_v22 = vmax.f32 %v3289_v2, 0.0  ;;  %v3306_v59 = vmax.f32 %v3290_v24, 0.0  ;;  %v3292_v32 = vadd.f32 %v3279_v53, %v3270_v31  ;;  %v3293_v4 = vadd.f32 %v3279_v53, %v3271_v18 }
 0x59f   :  { %4527 = vmatmul.mubr.msk.bf16.vlgmr.msra.gmra.mxu1 %vm209_vm1, %v3314_v21  ;;  %v3316_v16 = vpack.c.bf16 %v3304_v12, %v3303_v38  ;;  %v3307_v42 = vmax.f32 %v3291_v26, 0.0  ;;  %v3273_v33 = vmul.f32 %v3257_v1, %v5462_v0  ;;  %v3274_v11 = vmul.f32 %v3257_v1, %v5470_v3 }
 0x5a0   :  { %4530 = vmatprep.mubr.msk.bf16.mxu1 %vm209_vm1, %v3315_v7  ;;  %v3317_v17 = vpack.c.bf16 %v3306_v59, %v3305_v22  ;;  %v3308_v63 = vmax.f32 %v3292_v32, 0.0  ;;  %v3309_v56 = vmax.f32 %v3293_v4, 0.0 }
 0x5a1   :  { %v3295_v10 = vadd.f32 %v3279_v53, %v3273_v33  ;;  %v3296_v9 = vadd.f32 %v3279_v53, %v3274_v11 }
 0x5a2   :  { %v3318_v23 = vpack.c.bf16 %v3308_v63, %v3307_v42  ;;  %v3319_v30 = vpack.c.bf16 %v3310_v55, %v3309_v56 }
 0x5a3   :  { %v3311_v54 = vmax.f32 %v3295_v10, 0.0  ;;  %v3312_v8 = vmax.f32 %v3296_v9, 0.0 }
 0x5a5   :  { %v3320_v57 = vpack.c.bf16 %v3312_v8, %v3311_v54 }
 0x5a7   :  { %4531 = vmatmul.mubr.msk.bf16.gmra.mxu1 %vm209_vm1, %v3316_v16 }
 0x5a8   :  { %4534 = vmatprep.mubr.msk.bf16.mxu1 %vm209_vm1, %v3317_v17 }
 0x5af   :  { %4535 = vmatmul.mubr.msk.bf16.gmra.mxu1 %vm209_vm1, %v3318_v23 }
 0x5b0   :  { %4538 = vmatprep.mubr.msk.bf16.mxu1 %vm209_vm1, %v3319_v30 }
 0x5b7   :  { %4539 = vmatmul.mubr.msk.bf16.gmra.mxu1 %vm209_vm1, %v3320_v57 }
 0x65f   :  { %v5517_v0 = vpop.f32.mrf.mxu1 }
 0x660   :  { %v3487_v44 = vmul.f32 %v5517_v0, %v5517_v0  ;;  %v3451_v6 = vsel %vm85_vm0, %v5517_v0, 0.0 }
 0x661   :  { %v5519_v3 = vpop.f32.mrf.mxu1 }
 0x662   :  { %v3485_v46 = vmul.f32 %v5519_v3, %v5519_v3  ;;  %v3448_v49 = vsel %vm85_vm0, %v5519_v3, 0.0  ;;  %v3504_v34 = vsel %vm85_vm0, %v3487_v44, 0.0 }
 0x663   :  { %v5521_v61 = vpop.f32.mrf.mxu1 }
 0x664   :  { %v3501_v62 = vsel %vm85_vm0, %v3485_v46, 0.0  ;;  %v3488_v53 = vmul.f32 %v5521_v61, %v5521_v61  ;;  %v3453_v31 = vsel %vm85_vm0, %v5521_v61, 0.0 }
 0x665   :  { %v5525_v1 = vpop.f32.mrf.mxu1 }
 0x666   :  { %v3449_v47 = vsel %vm85_vm0, %v5525_v1, 0.0  ;;  %v3486_v19 = vmul.f32 %v5525_v1, %v5525_v1  ;;  %v3506_v37 = vsel %vm85_vm0, %v3488_v53, 0.0 }
 0x667   :  { %v3450_v40 = vadd.f32 %v3449_v47, %v3448_v49  ;;  %v5535_v45 = vpop.f32.mrf.mxu1 }
 0x668   :  { %v3502_v39 = vsel %vm85_vm0, %v3486_v19, 0.0  ;;  %v3491_v55 = vmul.f32 %v5535_v45, %v5535_v45  ;;  %v3459_v20 = vsel %vm85_vm0, %v5535_v45, 0.0 }
 0x669   :  { %v3452_v48 = vadd.f32 %v3451_v6, %v3450_v40  ;;  %v3503_v50 = vadd.f32 %v3502_v39, %v3501_v62  ;;  %v5543_v28 = vpop.f32.mrf.mxu1 }
 0x66a   :  { %v3489_v18 = vmul.f32 %v5543_v28, %v5543_v28  ;;  %v3455_v58 = vsel %vm85_vm0, %v5543_v28, 0.0  ;;  %v3512_v7 = vsel %vm85_vm0, %v3491_v55, 0.0 }
 0x66b   :  { %v3505_v43 = vadd.f32 %v3504_v34, %v3503_v50  ;;  %v3454_v52 = vadd.f32 %v3453_v31, %v3452_v48  ;;  %v5550_v60 = vpop.f32.mrf.mxu1 }
 0x66c   :  { %v3508_v51 = vsel %vm85_vm0, %v3489_v18, 0.0  ;;  %v3492_v29 = vmul.f32 %v5550_v60, %v5550_v60  ;;  %v3461_v12 = vsel %vm85_vm0, %v5550_v60, 0.0 }
 0x66d   :  { %v3456_v36 = vadd.f32 %v3455_v58, %v3454_v52  ;;  %v3507_v41 = vadd.f32 %v3506_v37, %v3505_v43  ;;  %v5555_v25 = vpop.f32.mrf.mxu1 }
 0x66e   :  { %v3457_v14 = vsel %vm85_vm0, %v5555_v25, 0.0  ;;  %v3490_v13 = vmul.f32 %v5555_v25, %v5555_v25  ;;  %v3514_v4 = vsel %vm85_vm0, %v3492_v29, 0.0 }
 0x66f   :  { %v3509_v15 = vadd.f32 %v3508_v51, %v3507_v41  ;;  %v3458_v5 = vadd.f32 %v3457_v14, %v3456_v36  ;;  %v5564_v27 = vpop.f32.mrf.mxu1 }
 0x670   :  { %v3510_v38 = vsel %vm85_vm0, %v3490_v13, 0.0  ;;  %v3495_v17 = vmul.f32 %v5564_v27, %v5564_v27  ;;  %v3467_v54 = vsel %vm85_vm0, %v5564_v27, 0.0 }
 0x671   :  { %v3460_v2 = vadd.f32 %v3459_v20, %v3458_v5  ;;  %v3511_v24 = vadd.f32 %v3510_v38, %v3509_v15  ;;  %v5571_v21 = vpop.f32.mrf.mxu1 }
 0x672   :  { %v3493_v26 = vmul.f32 %v5571_v21, %v5571_v21  ;;  %v3463_v16 = vsel %vm85_vm0, %v5571_v21, 0.0  ;;  %v3520_v47 = vsel %vm85_vm0, %v3495_v17, 0.0 }
 0x673   :  { %v3513_v22 = vadd.f32 %v3512_v7, %v3511_v24  ;;  %v3462_v59 = vadd.f32 %v3461_v12, %v3460_v2  ;;  %v5578_v32 = vpop.f32.mrf.mxu1 }
 0x674   :  { %v3516_v63 = vsel %vm85_vm0, %v3493_v26, 0.0  ;;  %v3496_v8 = vmul.f32 %v5578_v32, %v5578_v32  ;;  %v3469_v19 = vsel %vm85_vm0, %v5578_v32, 0.0 }
 0x675   :  { %v3464_v42 = vadd.f32 %v3463_v16, %v3462_v59  ;;  %v3515_v33 = vadd.f32 %v3514_v4, %v3513_v22  ;;  %v5583_v11 = vpop.f32.mrf.mxu1 }
 0x676   :  { %v3465_v56 = vsel %vm85_vm0, %v5583_v11, 0.0  ;;  %v3494_v10 = vmul.f32 %v5583_v11, %v5583_v11  ;;  %v3522_v39 = vsel %vm85_vm0, %v3496_v8, 0.0  ;;  %v3446_v8 = vld [vmem:[%s5768_s9] sm:$0x1] }
 0x677   :  { %v3517_v9 = vadd.f32 %v3516_v63, %v3515_v33  ;;  %v3466_v23 = vadd.f32 %v3465_v56, %v3464_v42  ;;  %v5592_v30 = vpop.f32.mrf.mxu1 }
 0x678   :  { %v3518_v57 = vsel %vm85_vm0, %v3494_v10, 0.0  ;;  %v3499_v18 = vmul.f32 %v5592_v30, %v5592_v30  ;;  %v3475_v41 = vsel %vm85_vm0, %v5592_v30, 0.0 }
 0x679   :  { %v3468_v46 = vadd.f32 %v3467_v54, %v3466_v23  ;;  %v3519_v44 = vadd.f32 %v3518_v57, %v3517_v9  ;;  %v5599_v49 = vpop.f32.mrf.mxu1 }
 0x67a   :  { %v3497_v40 = vmul.f32 %v5599_v49, %v5599_v49  ;;  %v3471_v48 = vsel %vm85_vm0, %v5599_v49, 0.0  ;;  %v3528_v15 = vsel %vm85_vm0, %v3499_v18, 0.0 }
 0x67b   :  { %v3521_v6 = vadd.f32 %v3520_v47, %v3519_v44  ;;  %v3470_v62 = vadd.f32 %v3469_v19, %v3468_v46  ;;  %v5606_v53 = vpop.f32.mrf.mxu1  ;;  %v3447_v44 = vld [vmem:[%s5769_s10] sm:$0x1] }
 0x67c   :  { %v3524_v43 = vsel %vm85_vm0, %v3497_v40, 0.0  ;;  %v3500_v55 = vmul.f32 %v5606_v53, %v5606_v53  ;;  %v3477_v5 = vsel %vm85_vm0, %v5606_v53, 0.0 }
 0x67d   :  { %v3472_v50 = vadd.f32 %v3471_v48, %v3470_v62  ;;  %v3523_v34 = vadd.f32 %v3522_v39, %v3521_v6  ;;  %v3434_v31 = vpop.f32.mrf.mxu1 }
 0x67e   :  { %v3473_v52 = vsel %vm85_vm0, %v3434_v31, 0.0  ;;  %v3498_v37 = vmul.f32 %v3434_v31, %v3434_v31  ;;  %v3530_v38 = vsel %vm85_vm0, %v3500_v55, 0.0 }
 0x67f   :  { %v3525_v58 = vadd.f32 %v3524_v43, %v3523_v34  ;;  %v3474_v36 = vadd.f32 %v3473_v52, %v3472_v50 }
 0x680   :  { %v3526_v51 = vsel %vm85_vm0, %v3498_v37, 0.0 }
 0x681   :  { %v3476_v14 = vadd.f32 %v3475_v41, %v3474_v36  ;;  %v3527_v13 = vadd.f32 %v3526_v51, %v3525_v58 }
 0x683   :  { %v3478_v20 = vadd.f32 %v3477_v5, %v3476_v14  ;;  %v3529_v29 = vadd.f32 %v3528_v15, %v3527_v13  ;;  %v4651_v5 = vld [vmem:[%s5759_s0 + $0x8] sm:$0xff] }
 0x685   :  { %v3479_v2 = vrot.slane %v3478_v20, 4  ;;  %v3531_v24 = vadd.f32 %v3530_v38, %v3529_v29  ;;  %v4652_v29 = vld [vmem:[%s5759_s0 + $0x10] sm:$0xff] }
 0x687   :  { %v3480_v7 = vadd.f32 %v3479_v2, %v3478_v20  ;;  %v3532_v12 = vrot.slane %v3531_v24, 4  ;;  %v4653_v2 = vld [vmem:[%s5759_s0 + $0x18] sm:$0xff] }
 0x689   :  { %v3481_v26 = vrot.slane %v3480_v7, 2  ;;  %v3533_v22 = vadd.f32 %v3532_v12, %v3531_v24 }
 0x68b   :  { %v3482_v59 = vadd.f32 %v3481_v26, %v3480_v7  ;;  %v3534_v4 = vrot.slane %v3533_v22, 2  ;;  %v4654_v7 = vld [vmem:[%s5759_s0 + $0x20] sm:$0xff]  ;;  %v4655_v26 = vld [vmem:[%s5759_s0 + $0x28] sm:$0xff] }
 0x68d   :  { %v3483_v16 = vrot.slane %v3482_v59, 1  ;;  %v3535_v42 = vadd.f32 %v3534_v4, %v3533_v22 }
 0x68f   :  { %v3484_v33 = vadd.f32 %v3483_v16, %v3482_v59  ;;  %v3536_v17 = vrot.slane %v3535_v42, 1  ;;  %v4656_v59 = vld [vmem:[%s5759_s0 + $0x30] sm:$0xff]  ;;  %v4657_v16 = vld [vmem:[%s5759_s0 + $0x38] sm:$0xff] }
 0x691   :  { %v3537_v63 = vadd.f32 %v3536_v17, %v3535_v42  ;;  %v3538_v56 = vmul.f32 0.0078125, %v3484_v33  ;;  %v4658_v33 = vld [vmem:[%s5759_s0 + $0x40] sm:$0xff] }
 0x693   :  { %v3539_v10 = vmul.f32 0.0078125, %v3537_v63  ;;  %v3540_v9 = vmul.f32 %v3538_v56, %v3538_v56  ;;  %v4659_v63 = vld [vmem:[%s5759_s0 + $0x48] sm:$0xff] }
 0x695   :  { %v3541_v23 = vsub.f32 %v3539_v10, %v3540_v9  ;;  %v4660_v10 = vld [vmem:[%s5759_s0 + $0x50] sm:$0xff] }
 0x697   :  { %v3542_v54 = vadd.f32 1e-05, %v3541_v23  ;;  %v4661_v23 = vld [vmem:[%s5759_s0 + $0x58] sm:$0xff] }
 0x699   :  { %4648 = vrsqrt.f32 %v3542_v54 }
 0x6a6   :  { %v4649_v57 = vpop.eup %4648 }
 0x6a7   :  { %v3544_v46 = vmul.f32 %v4649_v57, %v3446_v8  ;;  %v4662_v8 = vld [vmem:[%s5759_s0 + $0x60] sm:$0xff] }
 0x6a9   :  { %v3545_v47 = vmul.f32 %v3544_v46, %v3538_v56  ;;  %v3551_v19 = vrot.slane %v3544_v46, %v4916_v35  ;;  %v4663_v46 = vld [vmem:[%s5759_s0 + $0x68] sm:$0xff] }
 0x6ab   :  { %v3546_v40 = vsub.f32 %v3447_v44, %v3545_v47  ;;  %v3553_v6 = vmul.f32 %v3551_v19, %v5519_v3  ;;  %v3554_v62 = vmul.f32 %v3551_v19, %v5525_v1  ;;  %v3555_v39 = vmul.f32 %v5517_v0, %v3551_v19  ;;  %v4664_v47 = vld [vmem:[%s5759_s0 + $0x70] sm:$0xff] }
 0x6ac   :  { %v3556_v48 = vmul.f32 %v5521_v61, %v3551_v19  ;;  %v3557_v50 = vmul.f32 %v3551_v19, %v5543_v28  ;;  %v3558_v34 = vmul.f32 %v3551_v19, %v5555_v25  ;;  %v3559_v18 = vmul.f32 %v5535_v45, %v3551_v19 }
 0x6ad   :  { %v3560_v43 = vmul.f32 %v5550_v60, %v3551_v19  ;;  %v3561_v52 = vmul.f32 %v3551_v19, %v5571_v21  ;;  %v3562_v37 = vmul.f32 %v3551_v19, %v5583_v11  ;;  %v3563_v3 = vmul.f32 %v5564_v27, %v3551_v19 }
 0x6ae   :  { %v3564_v1 = vmul.f32 %v5578_v32, %v3551_v19  ;;  %v3573_v0 = vrot.slane %v3546_v40, %v4916_v35  ;;  %v3565_v61 = vmul.f32 %v3551_v19, %v5599_v49  ;;  %v3566_v58 = vmul.f32 %v3551_v19, %v3434_v31  ;;  %v4665_v40 = vld [vmem:[%s5759_s0 + $0x78] sm:$0xff] }
 0x6af   :  { %v3567_v28 = vmul.f32 %v5592_v30, %v3551_v19  ;;  %v3568_v25 = vmul.f32 %v5606_v53, %v3551_v19  ;;  %v4650_v30 = vld [vmem:[%s5759_s0] sm:$0xff] }
 0x6b0   :  { %v3575_v45 = vadd.f32 %v3573_v0, %v3553_v6  ;;  %v3576_v36 = vadd.f32 %v3573_v0, %v3554_v62  ;;  %v3577_v60 = vadd.f32 %v3573_v0, %v3555_v39  ;;  %v3578_v41 = vadd.f32 %v3573_v0, %v3556_v48 }
 0x6b1   :  { %v3579_v21 = vadd.f32 %v3573_v0, %v3557_v50  ;;  %v3580_v55 = vadd.f32 %v3573_v0, %v3558_v34  ;;  %v3581_v11 = vadd.f32 %v3573_v0, %v3559_v18  ;;  %v3582_v51 = vadd.f32 %v3573_v0, %v3560_v43 }
 0x6b2   :  { %v3583_v27 = vadd.f32 %v3573_v0, %v3561_v52  ;;  %v3584_v14 = vadd.f32 %v3573_v0, %v3562_v37  ;;  %v3585_v32 = vadd.f32 %v3573_v0, %v3563_v3  ;;  %v3586_v13 = vadd.f32 %v3573_v0, %v3564_v1 }
 0x6b3   :  { %v3587_v35 = vadd.f32 %v3573_v0, %v3565_v61  ;;  %v3588_v15 = vadd.f32 %v3573_v0, %v3566_v58  ;;  %v3589_v49 = vadd.f32 %v3573_v0, %v3567_v28  ;;  %v3590_v31 = vadd.f32 %v3573_v0, %v3568_v25 }
 0x6b4   :  { %v3591_v53 = vadd.f32 %v4650_v30, %v3575_v45  ;;  %v3592_v20 = vadd.f32 %v4651_v5, %v3576_v36  ;;  %v3593_v38 = vadd.f32 %v4652_v29, %v3577_v60  ;;  %v3594_v24 = vadd.f32 %v4653_v2, %v3578_v41 }
 0x6b5   :  { %v3595_v12 = vadd.f32 %v4654_v7, %v3579_v21  ;;  %v3596_v22 = vadd.f32 %v4655_v26, %v3580_v55  ;;  %v3597_v4 = vadd.f32 %v4656_v59, %v3581_v11  ;;  %v3598_v42 = vadd.f32 %v4657_v16, %v3582_v51 }
 0x6b6   :  { %v3599_v17 = vadd.f32 %v4658_v33, %v3583_v27  ;;  %v3600_v56 = vadd.f32 %v4659_v63, %v3584_v14  ;;  %v3601_v9 = vadd.f32 %v4660_v10, %v3585_v32  ;;  %v3602_v54 = vadd.f32 %v4661_v23, %v3586_v13 }
 0x6b7   :  { %v3603_v57 = vadd.f32 %v4662_v8, %v3587_v35  ;;  %v3604_v44 = vadd.f32 %v4663_v46, %v3588_v15  ;;  %v3605_v19 = vadd.f32 %v4664_v47, %v3589_v49  ;;  %v3606_v6 = vadd.f32 %v4665_v40, %v3590_v31 }
 0x6b8   :  { %v3607_v62 = vmax.f32 %v3591_v53, 0.0  ;;  %v3608_v39 = vmax.f32 %v3592_v20, 0.0  ;;  %v3609_v48 = vmax.f32 %v3593_v38, 0.0  ;;  %v3610_v50 = vmax.f32 %v3594_v24, 0.0 }
 0x6b9   :  { %v3611_v34 = vmax.f32 %v3595_v12, 0.0  ;;  %v3612_v18 = vmax.f32 %v3596_v22, 0.0  ;;  %v3613_v43 = vmax.f32 %v3597_v4, 0.0  ;;  %v3614_v52 = vmax.f32 %v3598_v42, 0.0 }
 0x6ba   :  { %v3615_v37 = vmax.f32 %v3599_v17, 0.0  ;;  %v3616_v3 = vmax.f32 %v3600_v56, 0.0  ;;  %v3617_v1 = vmax.f32 %v3601_v9, 0.0  ;;  %v3618_v0 = vmax.f32 %v3602_v54, 0.0  ;;  %3623 = vst.msk [vmem:[%s5770_s11] sm:$0xff] %vm85_vm0, %v3607_v62  ;;  %3624 = vst.msk [vmem:[%s5770_s11 + $0x8] sm:$0xff] %vm85_vm0, %v3608_v39 }
 0x6bb   :  { %3625 = vst.msk [vmem:[%s5770_s11 + $0x10] sm:$0xff] %vm85_vm0, %v3609_v48  ;;  %3626 = vst.msk [vmem:[%s5770_s11 + $0x18] sm:$0xff] %vm85_vm0, %v3610_v50  ;;  %v3619_v61 = vmax.f32 %v3603_v57, 0.0  ;;  %v3620_v58 = vmax.f32 %v3604_v44, 0.0  ;;  %v3621_v28 = vmax.f32 %v3605_v19, 0.0  ;;  %v3622_v25 = vmax.f32 %v3606_v6, 0.0 }
 0x6bc   :  { %3627 = vst.msk [vmem:[%s5770_s11 + $0x20] sm:$0xff] %vm85_vm0, %v3611_v34  ;;  %3628 = vst.msk [vmem:[%s5770_s11 + $0x28] sm:$0xff] %vm85_vm0, %v3612_v18 }
 0x6bd   :  { %3629 = vst.msk [vmem:[%s5770_s11 + $0x30] sm:$0xff] %vm85_vm0, %v3613_v43  ;;  %3630 = vst.msk [vmem:[%s5770_s11 + $0x38] sm:$0xff] %vm85_vm0, %v3614_v52 }
 0x6be   :  { %3631 = vst.msk [vmem:[%s5770_s11 + $0x40] sm:$0xff] %vm85_vm0, %v3615_v37  ;;  %3632 = vst.msk [vmem:[%s5770_s11 + $0x48] sm:$0xff] %vm85_vm0, %v3616_v3 }
 0x6bf   :  { %3633 = vst.msk [vmem:[%s5770_s11 + $0x50] sm:$0xff] %vm85_vm0, %v3617_v1  ;;  %3634 = vst.msk [vmem:[%s5770_s11 + $0x58] sm:$0xff] %vm85_vm0, %v3618_v0 }
 0x6c0   :  { %3635 = vst.msk [vmem:[%s5770_s11 + $0x60] sm:$0xff] %vm85_vm0, %v3619_v61  ;;  %3636 = vst.msk [vmem:[%s5770_s11 + $0x68] sm:$0xff] %vm85_vm0, %v3620_v58 }
 0x6c1   :  { %3637 = vst.msk [vmem:[%s5770_s11 + $0x70] sm:$0xff] %vm85_vm0, %v3621_v28  ;;  %3638 = vst.msk [vmem:[%s5770_s11 + $0x78] sm:$0xff] %vm85_vm0, %v3622_v25 }
 0x6c2   :  { %3643 = vsyncpa [#allocation3], 1 }

</bundles_post_ra>
